<compile_context>
chip_gen: v6e
topology: v6e:2x2x1
jax: 0.10.0
libtpu: 0.0.40
codegen_flags: <defaults>
</compile_context>

<pallas_src>
import jax
import jax.numpy as jnp
from jax.experimental import pallas as pl
from jax.experimental.pallas import tpu as pltpu

NEG_SLOPE = 0.2


def _make_fused_gat_kernel(heads, head_ch, fin, out_ch, n):
    """Fused gat1(concat=True)+ReLU -> gat2(heads=1, concat=False). Whole graph in VMEM."""
    hc = heads * head_ch
    row_b1 = 2 * heads
    row_b2 = 2 * heads + 1
    row_w2adst = 2 * heads + 2
    row_w2asrc = 2 * heads + 3

    def kernel(x_ref, w1_ref, w2_ref, slab_ref, adjb_ref, out_ref):
        x = x_ref[...]                               # [N, Fin]
        adj_bias = adjb_ref[...]                     # [N, N]; 0 on edges(+self), -1e30 else

        # ---------------- layer 1: H heads, concat=True, fused ReLU ----------------
        # Folded attention scores, independent of the projection (shorter MXU chain):
        #   a_dst[h, i] = <x_i, w1[h] @ att_dst1[h]>,  a_src[h, j] = <x_j, w1[h] @ att_src1[h]>
        a_dst = jax.lax.dot_general(
            slab_ref[0:heads, 0:fin], x, (((1,), (1,)), ((), ())),
            preferred_element_type=jnp.float32)      # [H, N]
        a_src = jax.lax.dot_general(
            slab_ref[heads:2 * heads, 0:fin], x, (((1,), (1,)), ((), ())),
            preferred_element_type=jnp.float32)      # [H, N]

        # Packed per-head projection in one MXU matmul: [N, Fin] @ [Fin, H*C]
        h_all = jnp.dot(x, w1_ref[...], preferred_element_type=jnp.float32)   # [N, H*C]

        # Head-stacked logits with one broadcast: e1[h, i, j] = a_dst[h, i] + a_src[h, j]
        e1 = a_dst[:, :, None] + a_src[:, None, :]                            # [H, N, N]
        e1 = jnp.where(e1 > 0, e1, NEG_SLOPE * e1) + adj_bias[None, :, :]     # LeakyReLU + mask
        m1 = jnp.max(e1, axis=-1, keepdims=True)
        p1 = jnp.exp(e1 - m1)                                                 # 0 on non-edges
        inv1 = pl.reciprocal(jnp.sum(p1, axis=-1, keepdims=True), approx=True)  # [H, N, 1]

        b1 = slab_ref[row_b1:row_b1 + 1, 0:hc]               # [1, H*C]
        b2 = slab_ref[row_b2:row_b2 + 1, 0:out_ch]           # [1, OUT]
        w2adstT = slab_ref[row_w2adst:row_w2adst + 1, 0:hc]  # [1, H*C]  (= (w2 @ att_dst2)^T)
        w2asrcT = slab_ref[row_w2asrc:row_w2asrc + 1, 0:hc]  # [1, H*C]  (= (w2 @ att_src2)^T)

        # -------- layer 2: per-head accumulation, x1 (concat) never materialized --------
        h2 = ad2 = as2 = None
        for h in range(heads):
            lo = h * head_ch
            hi = lo + head_ch
            o_h = jnp.dot(p1[h], h_all[:, lo:hi],
                          preferred_element_type=jnp.float32)                # [N, C]
            xh = jnp.maximum(o_h * inv1[h] + b1[:, lo:hi], 0.0)              # relu'd x1 slice
            t_h2 = jnp.dot(xh, w2_ref[lo:hi, :],
                           preferred_element_type=jnp.float32)               # [N, OUT]
            t_ad = jax.lax.dot_general(xh, w2adstT[:, lo:hi],
                                       (((1,), (1,)), ((), ())),
                                       preferred_element_type=jnp.float32)   # [N, 1]
            t_as = jax.lax.dot_general(w2asrcT[:, lo:hi], xh,
                                       (((1,), (1,)), ((), ())),
                                       preferred_element_type=jnp.float32)   # [1, N]
            h2 = t_h2 if h2 is None else h2 + t_h2
            ad2 = t_ad if ad2 is None else ad2 + t_ad
            as2 = t_as if as2 is None else as2 + t_as

        e2 = ad2 + as2                                                       # [N, N]
        e2 = jnp.where(e2 > 0, e2, NEG_SLOPE * e2) + adj_bias
        m2 = jnp.max(e2, axis=-1, keepdims=True)
        p2 = jnp.exp(e2 - m2)
        l2 = jnp.sum(p2, axis=-1, keepdims=True)
        o2 = jnp.dot(p2, h2, preferred_element_type=jnp.float32) / l2        # exact normalize
        out_ref[...] = (o2 + b2).astype(out_ref.dtype)

    return kernel


def precompute_gat_packing(params, edge_index, num_nodes):
    """One-time packing (hoisted out of the per-call path; cache per graph/params)."""
    heads, fin, c = params["w1"].shape
    out_ch = params["w2"].shape[-1]
    hc = heads * c

    # Dense additive adjacency bias: 0 on edges (+ self loops), -1e30 elsewhere.
    adj = jnp.zeros((num_nodes, num_nodes), jnp.float32)
    adj = adj.at[edge_index[1], edge_index[0]].set(1.0)      # adj[dst, src]
    idx = jnp.arange(num_nodes)
    adj = adj.at[idx, idx].set(1.0)
    adj_bias = (adj - 1.0) * 1e30

    # Packed layer-1 projection: column h*C+c holds w1[h, :, c].
    w1_packed = jnp.transpose(params["w1"], (1, 0, 2)).reshape(fin, hc)       # [Fin, H*C]

    # Fold attention vectors into x-side weights (heads on sublanes).
    w1_adstT = jnp.einsum("hfc,hc->hf", params["w1"], params["att_dst1"][:, 0, :])  # [H, Fin]
    w1_asrcT = jnp.einsum("hfc,hc->hf", params["w1"], params["att_src1"][:, 0, :])  # [H, Fin]

    w2 = params["w2"][0]                                                      # [H*C, OUT]
    w2_adstT = (w2 @ params["att_dst2"].reshape(out_ch, 1)).reshape(1, hc)    # [1, H*C]
    w2_asrcT = (w2 @ params["att_src2"].reshape(out_ch, 1)).reshape(1, hc)    # [1, H*C]

    b1 = params["bias1"].reshape(hc)
    b2 = params["bias2"].reshape(out_ch)

    # Pack the small operands into ONE lane-dense slab (fewer DMAs at kernel start).
    width = max(fin, hc, out_ch)
    slab = jnp.zeros((2 * heads + 4, width), jnp.float32)
    slab = slab.at[0:heads, 0:fin].set(w1_adstT)
    slab = slab.at[heads:2 * heads, 0:fin].set(w1_asrcT)
    slab = slab.at[2 * heads, 0:hc].set(b1)
    slab = slab.at[2 * heads + 1, 0:out_ch].set(b2)
    slab = slab.at[2 * heads + 2, 0:hc].set(w2_adstT[0])
    slab = slab.at[2 * heads + 3, 0:hc].set(w2_asrcT[0])

    return {
        "w1": w1_packed, "w2": w2, "slab": slab, "adj_bias": adj_bias,
        "dims": (heads, c, fin, out_ch, num_nodes),
    }


def make_gat_forward(packed):
    """Build a jitted forward(x) with all packed constants baked in."""
    heads, c, fin, out_ch, n = packed["dims"]
    kernel = _make_fused_gat_kernel(heads, c, fin, out_ch, n)
    w1, w2, slab, adjb = packed["w1"], packed["w2"], packed["slab"], packed["adj_bias"]
    vmem = pltpu.MemorySpace.VMEM

    call = pl.pallas_call(
        kernel,
        out_shape=jax.ShapeDtypeStruct((n, out_ch), jnp.float32),
        in_specs=[pl.BlockSpec(memory_space=vmem) for _ in range(5)],
        out_specs=pl.BlockSpec(memory_space=vmem),
    )

    @jax.jit
    def forward(x):
        return call(x, w1, w2, slab, adjb)

    return forward


def gat_module_reference(x, edge_index, params):
    """Pure-JAX reference matching PyG GATConv defaults (for correctness check)."""
    n = x.shape[0]
    adj = jnp.zeros((n, n), jnp.float32).at[edge_index[1], edge_index[0]].set(1.0)
    adj = adj.at[jnp.arange(n), jnp.arange(n)].set(1.0)
    mask = adj > 0.5

    def conv(h_in, w, a_s, a_d, b, concat):
        n_heads = w.shape[0]
        outs = []
        for h in range(n_heads):
            hh = h_in @ w[h]
            e = (hh @ a_d[h, 0])[:, None] + (hh @ a_s[h, 0])[None, :]
            e = jnp.where(e > 0, e, NEG_SLOPE * e)
            e = jnp.where(mask, e, -1e30)
            p = jax.nn.softmax(e, axis=-1)
            outs.append(p @ hh)
        if concat:
            return jnp.concatenate(outs, axis=1) + b.reshape(1, -1)
        return sum(outs) / n_heads + b.reshape(1, -1)

    h1 = jax.nn.relu(conv(x, params["w1"], params["att_src1"],
                          params["att_dst1"], params["bias1"], True))
    return conv(h1, params["w2"], params["att_src2"],
                params["att_dst2"], params["bias2"], False)


if __name__ == "__main__":
    # Scaled-down GATModule(in=1000, hidden=64, out=256, num_nodes=19, heads=4)
    N = 19
    IN_CH, HID_CH, OUT_CH, HEADS = 64, 32, 128, 4     # H*HID = 128, OUT = 128 (lane dense)

    key = jax.random.PRNGKey(0)
    ks = jax.random.split(key, 8)

    x = jax.random.normal(ks[0], (N, IN_CH), jnp.float32)

    # deterministic bidirectional ring graph; edge_index[0]=src, edge_index[1]=dst
    nodes = jnp.arange(N)
    src = jnp.concatenate([nodes, (nodes + 1) % N])
    dst = jnp.concatenate([(nodes + 1) % N, nodes])
    edge_index = jnp.stack([src, dst]).astype(jnp.int32)          # [2, 2N]

    s = 0.1
    params = {
        # layer 1: in -> hidden, 4 heads, concat=True
        "w1":       jax.random.normal(ks[1], (HEADS, IN_CH, HID_CH), jnp.float32) * s,
        "att_src1": jax.random.normal(ks[2], (HEADS, 1, HID_CH), jnp.float32) * s,
        "att_dst1": jax.random.normal(ks[3], (HEADS, 1, HID_CH), jnp.float32) * s,
        "bias1":    jnp.zeros((HEADS, 1, HID_CH), jnp.float32),   # PyG bias init = zeros
        # layer 2: hidden*heads -> out, 1 head, concat=False
        "w2":       jax.random.normal(ks[4], (1, HEADS * HID_CH, OUT_CH), jnp.float32) * s,
        "att_src2": jax.random.normal(ks[5], (1, 1, OUT_CH), jnp.float32) * s,
        "att_dst2": jax.random.normal(ks[6], (1, 1, OUT_CH), jnp.float32) * s,
        "bias2":    jnp.zeros((1, 1, OUT_CH), jnp.float32),
    }

    # One-time packing (per graph/params), then a jitted per-call path of one pallas_call.
    packed = jax.tree_util.tree_map(jax.block_until_ready,
                                    precompute_gat_packing(params, edge_index, N))
    forward = make_gat_forward(packed)

    y = forward(x)
    y = jax.block_until_ready(y)

    assert y.shape == (N, OUT_CH) and y.dtype == jnp.float32
    assert bool(jnp.all(jnp.isfinite(y)))

    y_ref = gat_module_reference(x, edge_index, params)
    assert bool(jnp.allclose(y, y_ref, rtol=2e-2, atol=2e-3)), \
        float(jnp.max(jnp.abs(y - y_ref)))

    print("KERNEL_OK")
</pallas_src>

<mosaic_0001>
module attributes {stable_mosaic.version = 11 : i64} {
  func.func @kernel(%arg0: memref<19x64xf32, #tpu.memory_space<vmem>>, %arg1: memref<64x128xf32, #tpu.memory_space<vmem>>, %arg2: memref<128x128xf32, #tpu.memory_space<vmem>>, %arg3: memref<12x128xf32, #tpu.memory_space<vmem>>, %arg4: memref<19x19xf32, #tpu.memory_space<vmem>>, %arg5: memref<19x128xf32, #tpu.memory_space<vmem>>) attributes {dimension_semantics = [], scalar_prefetch = 0 : i64, scratch_operands = 0 : i64, tpu.core_type = #tpu.core_type<tc>} {
    %c0 = arith.constant 0 : index
    %c0_0 = arith.constant 0 : index
    %0 = vector.load %arg0[%c0, %c0_0] : memref<19x64xf32, #tpu.memory_space<vmem>>, vector<19x64xf32>
    %c0_1 = arith.constant 0 : index
    %c0_2 = arith.constant 0 : index
    %1 = vector.load %arg4[%c0_1, %c0_2] : memref<19x19xf32, #tpu.memory_space<vmem>>, vector<19x19xf32>
    %c0_3 = arith.constant 0 : index
    %c0_4 = arith.constant 0 : index
    %2 = vector.load %arg3[%c0_3, %c0_4] : memref<12x128xf32, #tpu.memory_space<vmem>>, vector<4x64xf32>
    %cst = arith.constant dense<0.000000e+00> : vector<4x19xf32>
    %3 = tpu.matmul %2, %0, %cst {dimension_numbers = #tpu.dot_dimension_numbers<[1], [1], [0], [0], [0, 0, 1, 0], [], []>} : vector<4x64xf32>, vector<19x64xf32>, vector<4x19xf32> -> vector<4x19xf32>
    %c4 = arith.constant 4 : index
    %c0_5 = arith.constant 0 : index
    %4 = vector.load %arg3[%c4, %c0_5] : memref<12x128xf32, #tpu.memory_space<vmem>>, vector<4x64xf32>
    %cst_6 = arith.constant dense<0.000000e+00> : vector<4x19xf32>
    %5 = tpu.matmul %4, %0, %cst_6 {dimension_numbers = #tpu.dot_dimension_numbers<[1], [1], [0], [0], [0, 0, 1, 0], [], []>} : vector<4x64xf32>, vector<19x64xf32>, vector<4x19xf32> -> vector<4x19xf32>
    %c0_7 = arith.constant 0 : index
    %c0_8 = arith.constant 0 : index
    %6 = vector.load %arg1[%c0_7, %c0_8] : memref<64x128xf32, #tpu.memory_space<vmem>>, vector<64x128xf32>
    %cst_9 = arith.constant dense<0.000000e+00> : vector<19x128xf32>
    %7 = tpu.matmul %0, %6, %cst_9 {dimension_numbers = #tpu.dot_dimension_numbers<[1], [0], [0], [1], [0, 0, 1, 1], [], []>} : vector<19x64xf32>, vector<64x128xf32>, vector<19x128xf32> -> vector<19x128xf32>
    %8 = vector.shape_cast %3 : vector<4x19xf32> to vector<4x19x1xf32>
    %9 = vector.shape_cast %5 : vector<4x19xf32> to vector<4x1x19xf32>
    %10 = vector.broadcast %8 : vector<4x19x1xf32> to vector<4x19x19xf32>
    %11 = vector.broadcast %9 : vector<4x1x19xf32> to vector<4x19x19xf32>
    %12 = arith.addf %10, %11 : vector<4x19x19xf32>
    %cst_10 = arith.constant 0.000000e+00 : f32
    %13 = vector.broadcast %cst_10 : f32 to vector<4x19x19xf32>
    %14 = arith.cmpf ogt, %12, %13 : vector<4x19x19xf32>
    %cst_11 = arith.constant 2.000000e-01 : f32
    %15 = vector.broadcast %cst_11 : f32 to vector<4x19x19xf32>
    %16 = arith.mulf %15, %12 : vector<4x19x19xf32>
    %17 = arith.select %14, %12, %16 : vector<4x19x19xi1>, vector<4x19x19xf32>
    %18 = vector.shape_cast %1 : vector<19x19xf32> to vector<1x19x19xf32>
    %19 = vector.broadcast %18 : vector<1x19x19xf32> to vector<4x19x19xf32>
    %20 = arith.addf %17, %19 : vector<4x19x19xf32>
    %cst_12 = arith.constant dense<0xFF800000> : vector<4x19xf32>
    %21 = vector.multi_reduction <maximumf>, %20, %cst_12 [2] : vector<4x19x19xf32> to vector<4x19xf32>
    %22 = vector.shape_cast %21 : vector<4x19xf32> to vector<4x19x1xf32>
    %23 = vector.broadcast %22 : vector<4x19x1xf32> to vector<4x19x19xf32>
    %24 = arith.subf %20, %23 : vector<4x19x19xf32>
    %25 = math.exp %24 : vector<4x19x19xf32>
    %cst_13 = arith.constant dense<0.000000e+00> : vector<4x19xf32>
    %26 = vector.multi_reduction <add>, %25, %cst_13 [2] : vector<4x19x19xf32> to vector<4x19xf32>
    %27 = vector.shape_cast %26 : vector<4x19xf32> to vector<4x19x1xf32>
    %28 = tpu.reciprocal %27 {approx = true} : vector<4x19x1xf32> -> vector<4x19x1xf32>
    %c8 = arith.constant 8 : index
    %c0_14 = arith.constant 0 : index
    %29 = vector.load %arg3[%c8, %c0_14] : memref<12x128xf32, #tpu.memory_space<vmem>>, vector<1x128xf32>
    %c9 = arith.constant 9 : index
    %c0_15 = arith.constant 0 : index
    %30 = vector.load %arg3[%c9, %c0_15] : memref<12x128xf32, #tpu.memory_space<vmem>>, vector<1x128xf32>
    %c10 = arith.constant 10 : index
    %c0_16 = arith.constant 0 : index
    %31 = vector.load %arg3[%c10, %c0_16] : memref<12x128xf32, #tpu.memory_space<vmem>>, vector<1x128xf32>
    %c11 = arith.constant 11 : index
    %c0_17 = arith.constant 0 : index
    %32 = vector.load %arg3[%c11, %c0_17] : memref<12x128xf32, #tpu.memory_space<vmem>>, vector<1x128xf32>
    %33 = vector.extract_strided_slice %25 {offsets = [0, 0, 0], sizes = [1, 19, 19], strides = [1, 1, 1]} : vector<4x19x19xf32> to vector<1x19x19xf32>
    %34 = vector.shape_cast %33 : vector<1x19x19xf32> to vector<19x19xf32>
    %35 = vector.extract_strided_slice %7 {offsets = [0, 0], sizes = [19, 32], strides = [1, 1]} : vector<19x128xf32> to vector<19x32xf32>
    %cst_18 = arith.constant dense<0.000000e+00> : vector<19x32xf32>
    %36 = tpu.matmul %34, %35, %cst_18 {dimension_numbers = #tpu.dot_dimension_numbers<[1], [0], [0], [1], [0, 0, 1, 1], [], []>} : vector<19x19xf32>, vector<19x32xf32>, vector<19x32xf32> -> vector<19x32xf32>
    %37 = vector.extract_strided_slice %28 {offsets = [0, 0, 0], sizes = [1, 19, 1], strides = [1, 1, 1]} : vector<4x19x1xf32> to vector<1x19x1xf32>
    %38 = vector.shape_cast %37 : vector<1x19x1xf32> to vector<19x1xf32>
    %39 = vector.broadcast %38 : vector<19x1xf32> to vector<19x32xf32>
    %40 = arith.mulf %36, %39 : vector<19x32xf32>
    %41 = vector.extract_strided_slice %29 {offsets = [0, 0], sizes = [1, 32], strides = [1, 1]} : vector<1x128xf32> to vector<1x32xf32>
    %42 = vector.broadcast %41 : vector<1x32xf32> to vector<19x32xf32>
    %43 = arith.addf %40, %42 : vector<19x32xf32>
    %cst_19 = arith.constant 0.000000e+00 : f32
    %44 = vector.broadcast %cst_19 : f32 to vector<19x32xf32>
    %45 = arith.maximumf %43, %44 : vector<19x32xf32>
    %c0_20 = arith.constant 0 : index
    %c0_21 = arith.constant 0 : index
    %46 = vector.load %arg2[%c0_20, %c0_21] : memref<128x128xf32, #tpu.memory_space<vmem>>, vector<32x128xf32>
    %cst_22 = arith.constant dense<0.000000e+00> : vector<19x128xf32>
    %47 = tpu.matmul %45, %46, %cst_22 {dimension_numbers = #tpu.dot_dimension_numbers<[1], [0], [0], [1], [0, 0, 1, 1], [], []>} : vector<19x32xf32>, vector<32x128xf32>, vector<19x128xf32> -> vector<19x128xf32>
    %48 = vector.extract_strided_slice %31 {offsets = [0, 0], sizes = [1, 32], strides = [1, 1]} : vector<1x128xf32> to vector<1x32xf32>
    %cst_23 = arith.constant dense<0.000000e+00> : vector<19x1xf32>
    %49 = tpu.matmul %45, %48, %cst_23 {dimension_numbers = #tpu.dot_dimension_numbers<[1], [1], [0], [0], [0, 0, 1, 0], [], []>} : vector<19x32xf32>, vector<1x32xf32>, vector<19x1xf32> -> vector<19x1xf32>
    %50 = vector.extract_strided_slice %32 {offsets = [0, 0], sizes = [1, 32], strides = [1, 1]} : vector<1x128xf32> to vector<1x32xf32>
    %cst_24 = arith.constant dense<0.000000e+00> : vector<1x19xf32>
    %51 = tpu.matmul %50, %45, %cst_24 {dimension_numbers = #tpu.dot_dimension_numbers<[1], [1], [0], [0], [0, 0, 1, 0], [], []>} : vector<1x32xf32>, vector<19x32xf32>, vector<1x19xf32> -> vector<1x19xf32>
    %52 = vector.extract_strided_slice %25 {offsets = [1, 0, 0], sizes = [1, 19, 19], strides = [1, 1, 1]} : vector<4x19x19xf32> to vector<1x19x19xf32>
    %53 = vector.shape_cast %52 : vector<1x19x19xf32> to vector<19x19xf32>
    %54 = vector.extract_strided_slice %7 {offsets = [0, 32], sizes = [19, 32], strides = [1, 1]} : vector<19x128xf32> to vector<19x32xf32>
    %cst_25 = arith.constant dense<0.000000e+00> : vector<19x32xf32>
    %55 = tpu.matmul %53, %54, %cst_25 {dimension_numbers = #tpu.dot_dimension_numbers<[1], [0], [0], [1], [0, 0, 1, 1], [], []>} : vector<19x19xf32>, vector<19x32xf32>, vector<19x32xf32> -> vector<19x32xf32>
    %56 = vector.extract_strided_slice %28 {offsets = [1, 0, 0], sizes = [1, 19, 1], strides = [1, 1, 1]} : vector<4x19x1xf32> to vector<1x19x1xf32>
    %57 = vector.shape_cast %56 : vector<1x19x1xf32> to vector<19x1xf32>
    %58 = vector.broadcast %57 : vector<19x1xf32> to vector<19x32xf32>
    %59 = arith.mulf %55, %58 : vector<19x32xf32>
    %60 = vector.extract_strided_slice %29 {offsets = [0, 32], sizes = [1, 32], strides = [1, 1]} : vector<1x128xf32> to vector<1x32xf32>
    %61 = vector.broadcast %60 : vector<1x32xf32> to vector<19x32xf32>
    %62 = arith.addf %59, %61 : vector<19x32xf32>
    %cst_26 = arith.constant 0.000000e+00 : f32
    %63 = vector.broadcast %cst_26 : f32 to vector<19x32xf32>
    %64 = arith.maximumf %62, %63 : vector<19x32xf32>
    %c32 = arith.constant 32 : index
    %c0_27 = arith.constant 0 : index
    %65 = vector.load %arg2[%c32, %c0_27] : memref<128x128xf32, #tpu.memory_space<vmem>>, vector<32x128xf32>
    %cst_28 = arith.constant dense<0.000000e+00> : vector<19x128xf32>
    %66 = tpu.matmul %64, %65, %cst_28 {dimension_numbers = #tpu.dot_dimension_numbers<[1], [0], [0], [1], [0, 0, 1, 1], [], []>} : vector<19x32xf32>, vector<32x128xf32>, vector<19x128xf32> -> vector<19x128xf32>
    %67 = vector.extract_strided_slice %31 {offsets = [0, 32], sizes = [1, 32], strides = [1, 1]} : vector<1x128xf32> to vector<1x32xf32>
    %cst_29 = arith.constant dense<0.000000e+00> : vector<19x1xf32>
    %68 = tpu.matmul %64, %67, %cst_29 {dimension_numbers = #tpu.dot_dimension_numbers<[1], [1], [0], [0], [0, 0, 1, 0], [], []>} : vector<19x32xf32>, vector<1x32xf32>, vector<19x1xf32> -> vector<19x1xf32>
    %69 = vector.extract_strided_slice %32 {offsets = [0, 32], sizes = [1, 32], strides = [1, 1]} : vector<1x128xf32> to vector<1x32xf32>
    %cst_30 = arith.constant dense<0.000000e+00> : vector<1x19xf32>
    %70 = tpu.matmul %69, %64, %cst_30 {dimension_numbers = #tpu.dot_dimension_numbers<[1], [1], [0], [0], [0, 0, 1, 0], [], []>} : vector<1x32xf32>, vector<19x32xf32>, vector<1x19xf32> -> vector<1x19xf32>
    %71 = arith.addf %47, %66 : vector<19x128xf32>
    %72 = arith.addf %49, %68 : vector<19x1xf32>
    %73 = arith.addf %51, %70 : vector<1x19xf32>
    %74 = vector.extract_strided_slice %25 {offsets = [2, 0, 0], sizes = [1, 19, 19], strides = [1, 1, 1]} : vector<4x19x19xf32> to vector<1x19x19xf32>
    %75 = vector.shape_cast %74 : vector<1x19x19xf32> to vector<19x19xf32>
    %76 = vector.extract_strided_slice %7 {offsets = [0, 64], sizes = [19, 32], strides = [1, 1]} : vector<19x128xf32> to vector<19x32xf32>
    %cst_31 = arith.constant dense<0.000000e+00> : vector<19x32xf32>
    %77 = tpu.matmul %75, %76, %cst_31 {dimension_numbers = #tpu.dot_dimension_numbers<[1], [0], [0], [1], [0, 0, 1, 1], [], []>} : vector<19x19xf32>, vector<19x32xf32>, vector<19x32xf32> -> vector<19x32xf32>
    %78 = vector.extract_strided_slice %28 {offsets = [2, 0, 0], sizes = [1, 19, 1], strides = [1, 1, 1]} : vector<4x19x1xf32> to vector<1x19x1xf32>
    %79 = vector.shape_cast %78 : vector<1x19x1xf32> to vector<19x1xf32>
    %80 = vector.broadcast %79 : vector<19x1xf32> to vector<19x32xf32>
    %81 = arith.mulf %77, %80 : vector<19x32xf32>
    %82 = vector.extract_strided_slice %29 {offsets = [0, 64], sizes = [1, 32], strides = [1, 1]} : vector<1x128xf32> to vector<1x32xf32>
    %83 = vector.broadcast %82 : vector<1x32xf32> to vector<19x32xf32>
    %84 = arith.addf %81, %83 : vector<19x32xf32>
    %cst_32 = arith.constant 0.000000e+00 : f32
    %85 = vector.broadcast %cst_32 : f32 to vector<19x32xf32>
    %86 = arith.maximumf %84, %85 : vector<19x32xf32>
    %c64 = arith.constant 64 : index
    %c0_33 = arith.constant 0 : index
    %87 = vector.load %arg2[%c64, %c0_33] : memref<128x128xf32, #tpu.memory_space<vmem>>, vector<32x128xf32>
    %cst_34 = arith.constant dense<0.000000e+00> : vector<19x128xf32>
    %88 = tpu.matmul %86, %87, %cst_34 {dimension_numbers = #tpu.dot_dimension_numbers<[1], [0], [0], [1], [0, 0, 1, 1], [], []>} : vector<19x32xf32>, vector<32x128xf32>, vector<19x128xf32> -> vector<19x128xf32>
    %89 = vector.extract_strided_slice %31 {offsets = [0, 64], sizes = [1, 32], strides = [1, 1]} : vector<1x128xf32> to vector<1x32xf32>
    %cst_35 = arith.constant dense<0.000000e+00> : vector<19x1xf32>
    %90 = tpu.matmul %86, %89, %cst_35 {dimension_numbers = #tpu.dot_dimension_numbers<[1], [1], [0], [0], [0, 0, 1, 0], [], []>} : vector<19x32xf32>, vector<1x32xf32>, vector<19x1xf32> -> vector<19x1xf32>
    %91 = vector.extract_strided_slice %32 {offsets = [0, 64], sizes = [1, 32], strides = [1, 1]} : vector<1x128xf32> to vector<1x32xf32>
    %cst_36 = arith.constant dense<0.000000e+00> : vector<1x19xf32>
    %92 = tpu.matmul %91, %86, %cst_36 {dimension_numbers = #tpu.dot_dimension_numbers<[1], [1], [0], [0], [0, 0, 1, 0], [], []>} : vector<1x32xf32>, vector<19x32xf32>, vector<1x19xf32> -> vector<1x19xf32>
    %93 = arith.addf %71, %88 : vector<19x128xf32>
    %94 = arith.addf %72, %90 : vector<19x1xf32>
    %95 = arith.addf %73, %92 : vector<1x19xf32>
    %96 = vector.extract_strided_slice %25 {offsets = [3, 0, 0], sizes = [1, 19, 19], strides = [1, 1, 1]} : vector<4x19x19xf32> to vector<1x19x19xf32>
    %97 = vector.shape_cast %96 : vector<1x19x19xf32> to vector<19x19xf32>
    %98 = vector.extract_strided_slice %7 {offsets = [0, 96], sizes = [19, 32], strides = [1, 1]} : vector<19x128xf32> to vector<19x32xf32>
    %cst_37 = arith.constant dense<0.000000e+00> : vector<19x32xf32>
    %99 = tpu.matmul %97, %98, %cst_37 {dimension_numbers = #tpu.dot_dimension_numbers<[1], [0], [0], [1], [0, 0, 1, 1], [], []>} : vector<19x19xf32>, vector<19x32xf32>, vector<19x32xf32> -> vector<19x32xf32>
    %100 = vector.extract_strided_slice %28 {offsets = [3, 0, 0], sizes = [1, 19, 1], strides = [1, 1, 1]} : vector<4x19x1xf32> to vector<1x19x1xf32>
    %101 = vector.shape_cast %100 : vector<1x19x1xf32> to vector<19x1xf32>
    %102 = vector.broadcast %101 : vector<19x1xf32> to vector<19x32xf32>
    %103 = arith.mulf %99, %102 : vector<19x32xf32>
    %104 = vector.extract_strided_slice %29 {offsets = [0, 96], sizes = [1, 32], strides = [1, 1]} : vector<1x128xf32> to vector<1x32xf32>
    %105 = vector.broadcast %104 : vector<1x32xf32> to vector<19x32xf32>
    %106 = arith.addf %103, %105 : vector<19x32xf32>
    %cst_38 = arith.constant 0.000000e+00 : f32
    %107 = vector.broadcast %cst_38 : f32 to vector<19x32xf32>
    %108 = arith.maximumf %106, %107 : vector<19x32xf32>
    %c96 = arith.constant 96 : index
    %c0_39 = arith.constant 0 : index
    %109 = vector.load %arg2[%c96, %c0_39] : memref<128x128xf32, #tpu.memory_space<vmem>>, vector<32x128xf32>
    %cst_40 = arith.constant dense<0.000000e+00> : vector<19x128xf32>
    %110 = tpu.matmul %108, %109, %cst_40 {dimension_numbers = #tpu.dot_dimension_numbers<[1], [0], [0], [1], [0, 0, 1, 1], [], []>} : vector<19x32xf32>, vector<32x128xf32>, vector<19x128xf32> -> vector<19x128xf32>
    %111 = vector.extract_strided_slice %31 {offsets = [0, 96], sizes = [1, 32], strides = [1, 1]} : vector<1x128xf32> to vector<1x32xf32>
    %cst_41 = arith.constant dense<0.000000e+00> : vector<19x1xf32>
    %112 = tpu.matmul %108, %111, %cst_41 {dimension_numbers = #tpu.dot_dimension_numbers<[1], [1], [0], [0], [0, 0, 1, 0], [], []>} : vector<19x32xf32>, vector<1x32xf32>, vector<19x1xf32> -> vector<19x1xf32>
    %113 = vector.extract_strided_slice %32 {offsets = [0, 96], sizes = [1, 32], strides = [1, 1]} : vector<1x128xf32> to vector<1x32xf32>
    %cst_42 = arith.constant dense<0.000000e+00> : vector<1x19xf32>
    %114 = tpu.matmul %113, %108, %cst_42 {dimension_numbers = #tpu.dot_dimension_numbers<[1], [1], [0], [0], [0, 0, 1, 0], [], []>} : vector<1x32xf32>, vector<19x32xf32>, vector<1x19xf32> -> vector<1x19xf32>
    %115 = arith.addf %93, %110 : vector<19x128xf32>
    %116 = arith.addf %94, %112 : vector<19x1xf32>
    %117 = arith.addf %95, %114 : vector<1x19xf32>
    %118 = vector.broadcast %116 : vector<19x1xf32> to vector<19x19xf32>
    %119 = vector.broadcast %117 : vector<1x19xf32> to vector<19x19xf32>
    %120 = arith.addf %118, %119 : vector<19x19xf32>
    %cst_43 = arith.constant 0.000000e+00 : f32
    %121 = vector.broadcast %cst_43 : f32 to vector<19x19xf32>
    %122 = arith.cmpf ogt, %120, %121 : vector<19x19xf32>
    %cst_44 = arith.constant 2.000000e-01 : f32
    %123 = vector.broadcast %cst_44 : f32 to vector<19x19xf32>
    %124 = arith.mulf %123, %120 : vector<19x19xf32>
    %125 = arith.select %122, %120, %124 : vector<19x19xi1>, vector<19x19xf32>
    %126 = arith.addf %125, %1 : vector<19x19xf32>
    %cst_45 = arith.constant dense<0xFF800000> : vector<19xf32>
    %127 = vector.multi_reduction <maximumf>, %126, %cst_45 [1] : vector<19x19xf32> to vector<19xf32>
    %128 = vector.shape_cast %127 : vector<19xf32> to vector<19x1xf32>
    %129 = vector.broadcast %128 : vector<19x1xf32> to vector<19x19xf32>
    %130 = arith.subf %126, %129 : vector<19x19xf32>
    %131 = math.exp %130 : vector<19x19xf32>
    %cst_46 = arith.constant dense<0.000000e+00> : vector<19xf32>
    %132 = vector.multi_reduction <add>, %131, %cst_46 [1] : vector<19x19xf32> to vector<19xf32>
    %133 = vector.shape_cast %132 : vector<19xf32> to vector<19x1xf32>
    %cst_47 = arith.constant dense<0.000000e+00> : vector<19x128xf32>
    %134 = tpu.matmul %131, %115, %cst_47 {dimension_numbers = #tpu.dot_dimension_numbers<[1], [0], [0], [1], [0, 0, 1, 1], [], []>} : vector<19x19xf32>, vector<19x128xf32>, vector<19x128xf32> -> vector<19x128xf32>
    %135 = vector.broadcast %133 : vector<19x1xf32> to vector<19x128xf32>
    %136 = arith.divf %134, %135 : vector<19x128xf32>
    %137 = vector.broadcast %30 : vector<1x128xf32> to vector<19x128xf32>
    %138 = arith.addf %136, %137 : vector<19x128xf32>
    %c0_48 = arith.constant 0 : index
    %c0_49 = arith.constant 0 : index
    %139 = vector.load %arg5[%c0_48, %c0_49] : memref<19x128xf32, #tpu.memory_space<vmem>>, vector<19x128xf32>
    tpu.vector_store %arg5[%c0_48, %c0_49], %138 {strides = array<i32>} : memref<19x128xf32, #tpu.memory_space<vmem>>, vector<19x128xf32>,
    return
  }
}

</mosaic_0001>

<bundles_post_ra>
// kernel: forward.1
= control target key start
LH: loop header
LB: loop body
LE: loop exit
PB: predicated region body
PF: predicated region fallthrough
CT: control target
= control target key end

     0   :  { %10 = vsyncpa [#allocation3], 0  ;;  %s3105_s0 = inlined_call_operand.hbm [shape: f32[19,64], index: 0, kind: input, shape index: {}]   ;;  %s3106_s1 = inlined_call_operand.hbm [shape: f32[64,128], index: 1, kind: input, shape index: {}]   ;;  %s3107_s2 = inlined_call_operand.hbm [shape: f32[128,128], index: 2, kind: input, shape index: {}]   ;;  %s3108_s3 = inlined_call_operand.hbm [shape: f32[12,128], index: 3, kind: input, shape index: {}]   ;;  %s3109_s4 = inlined_call_operand.hbm [shape: f32[19,19], index: 4, kind: input, shape index: {}]   ;;  %s3110_s5 = inlined_call_operand.hbm [shape: f32[19,128], index: 5, kind: output, shape index: {}]  }
   0x1   :  { %11 = vsyncpa [#allocation6], 0 }
   0x2   :  { %12 = vsyncpa [#allocation9], 0 }
   0x3   :  { %13 = vsyncpa [#allocation4], 0  ;;  %s2577_s18 = smov [#allocation5]   ;;  %s2578_s20 = smov [#allocation8]  }
   0x4   :  { %s31_s19 = sshll.u32 %s2577_s18, 4  ;;  %s55_s21 = sshll.u32 %s2578_s20, 4  ;;  %s32_s19 = int_to_ptr.vmem [resolvable:$true] %s31_s19  ;;  %s56_s21 = int_to_ptr.vmem [resolvable:$true] %s55_s21 }
   0x5   :  { %s2457_s22 = scalar_lea.vmem %s32_s19, 1024  ;;  %p2462_p1 = scmp.lt.s32.totalorder %s32_s19, %s32_s19 }
   0x6   :  { %p2458_p0 = scmp.ne.s32.totalorder %s32_s19, %s2457_s22  ;;  %p2463_p2 = scmp.lt.s32.totalorder %s2457_s22, %s2457_s22 }
   0x8   :  { %p2464_p3 = por %p2463_p2, %p2462_p1 }
   0xa   :  { %p2465_p4 = pnand %p2464_p3, %p2458_p0 }
   0xc   :  { %2468 = shalt.err (!%p2465_p4)
}
   0xd   :  { %s2579_s23 = smov 128   ;;  %s2580_s24 = smov 8  }
   0xe   :  { %37 = dma.hbm_to_vmem [thread:$0]  %s3106_s1, 1024, %s32_s19, [#allocation6], %s2579_s23, %s2579_s23, %s2580_s24  }
   0xf   :  { %s2477_s27 = scalar_lea.vmem %s56_s21, 256  ;;  %p2482_p6 = scmp.lt.s32.totalorder %s56_s21, %s56_s21 }
  0x10   :  { %p2478_p5 = scmp.ne.s32.totalorder %s56_s21, %s2477_s27  ;;  %p2483_p7 = scmp.lt.s32.totalorder %s2477_s27, %s2477_s27 }
  0x12   :  { %p2484_p8 = por %p2483_p7, %p2482_p6 }
  0x14   :  { %p2485_p9 = pnand %p2484_p8, %p2478_p5 }
  0x16   :  { %2488 = shalt.err (!%p2485_p9)
}
  0x17   :  { %61 = dma.hbm_to_vmem [thread:$0]  %s3108_s3, 256, %s56_s21, [#allocation9], %s2579_s23, %s2579_s23, %s2580_s24  }
  0x18   :  { %s2581_s30 = smov [#allocation2]   ;;  %s2582_s7 = smov [#allocation7]  }
  0x19   :  { %s19_s6 = sshll.u32 %s2581_s30, 4  ;;  %s43_s8 = sshll.u32 %s2582_s7, 4  ;;  %s20_s6 = int_to_ptr.vmem [resolvable:$true] %s19_s6  ;;  %s44_s8 = int_to_ptr.vmem [resolvable:$true] %s43_s8 }
  0x1a   :  { %s2497_s1 = scalar_lea.vmem %s20_s6, 384  ;;  %p2502_p11 = scmp.lt.s32.totalorder %s20_s6, %s20_s6 }
  0x1b   :  { %p2498_p10 = scmp.ne.s32.totalorder %s20_s6, %s2497_s1  ;;  %p2503_p12 = scmp.lt.s32.totalorder %s2497_s1, %s2497_s1 }
  0x1d   :  { %p2504_p13 = por %p2503_p12, %p2502_p11 }
  0x1f   :  { %p2505_p0 = pnand %p2504_p13, %p2498_p10 }
  0x21   :  { %2508 = shalt.err (!%p2505_p0)
}
  0x22   :  { %25 = dma.hbm_to_vmem [thread:$0]  %s3105_s0, 384, %s20_s6, [#allocation3], %s2579_s23, %s2579_s23, %s2580_s24  }
  0x23   :  { %s2517_s3 = scalar_lea.vmem %s44_s8, 2048  ;;  %p2522_p2 = scmp.lt.s32.totalorder %s44_s8, %s44_s8 }
  0x24   :  { %p2518_p1 = scmp.ne.s32.totalorder %s44_s8, %s2517_s3  ;;  %p2523_p3 = scmp.lt.s32.totalorder %s2517_s3, %s2517_s3 }
  0x26   :  { %p2524_p4 = por %p2523_p3, %p2522_p2 }
  0x28   :  { %p2525_p5 = pnand %p2524_p4, %p2518_p1 }
  0x2a   :  { %2528 = shalt.err (!%p2525_p5)
}
  0x2b   :  { %49 = dma.hbm_to_vmem [thread:$0]  %s3107_s2, 2048, %s44_s8, [#allocation6], %s2579_s23, %s2579_s23, %s2580_s24  }
  0x2c   :  { %s2583_s13 = smov [#allocation10]  }
  0x2d   :  { %s67_s14 = sshll.u32 %s2583_s13, 4  ;;  %s68_s14 = int_to_ptr.vmem [resolvable:$true] %s67_s14 }
  0x2e   :  { %s2537_s15 = scalar_lea.vmem %s68_s14, 384  ;;  %p2542_p7 = scmp.lt.s32.totalorder %s68_s14, %s68_s14 }
  0x2f   :  { %p2538_p6 = scmp.ne.s32.totalorder %s68_s14, %s2537_s15  ;;  %p2543_p8 = scmp.lt.s32.totalorder %s2537_s15, %s2537_s15 }
  0x31   :  { %p2544_p9 = por %p2543_p8, %p2542_p7 }
  0x33   :  { %p2545_p10 = pnand %p2544_p9, %p2538_p6 }
  0x35   :  { %2548 = shalt.err (!%p2545_p10)
}
  0x36   :  { %73 = dma.hbm_to_vmem [thread:$0]  %s3109_s4, 384, %s68_s14, [#allocation9], %s2579_s23, %s2579_s23, %s2580_s24  }
  0x37   :  { %2569 = dma.done.wait [#allocation3], 384  }
  0x38   :  { %2570 = vsyncadd [#allocation3], 4294966912 }
  0x39   :  { %2571 = dma.done.wait [#allocation6], 3072  }
  0x3a   :  { %2572 = vsyncadd [#allocation6], 4294964224 }
  0x3b   :  { %2573 = dma.done.wait [#allocation9], 640  }
  0x3c   :  { %2574 = vsyncadd [#allocation9], 4294966656  ;;  %v2584_v0 = vmov 0.0   ;;  %vm2585_vm0 = vmmov 0   ;;  %vm96_vm1 = vcmask 523264   ;;  %v90_v2 = vld [vmem:[#allocation2 + $0x8] sm:$0xff]  ;;  %v341_v14 = vlaneseq }
  0x3d   :  { %2150 = vmatprep.subr.mxu0 %v2584_v0  ;;  %2156 = vmatprep.mubr.msk.f32.mxu0 %vm2585_vm0, %v2584_v0  ;;  %v91_v1 = vld [vmem:[#allocation2 + $0x10] sm:$0x7]  ;;  %v89_v3 = vld [vmem:[#allocation2] sm:$0xff]  ;;  %v95_v4 = vld [vmem:[#allocation8] sm:$0xf]  ;;  %vm641_vm2 = vcmask 1042432  }
  0x3e   :  { %2159 = vmatprep.subr.mxu1 %v2584_v0  ;;  %2165 = vmatprep.mubr.msk.f32.mxu1 %vm2585_vm0, %v2584_v0  ;;  %v179_v5 = vld [vmem:[#allocation8 + $0x4] sm:$0xf]  ;;  %v260_v6 = vld [vmem:[#allocation5 + $0x38] sm:$0xff]  ;;  %v259_v7 = vld [vmem:[#allocation5 + $0x30] sm:$0xff]  ;;  %v2586_v15 = vmov 1966171168  }
  0x3f   :  { %2151 = vmatpush3.xpose.msk.msra.mxu0 %vm96_vm1, %v91_v1  ;;  %2160 = vmatpush3.xpose.msk.msra.mxu1 %vm96_vm1, %v91_v1  ;;  %v258_v8 = vld [vmem:[#allocation5 + $0x28] sm:$0xff]  ;;  %v257_v9 = vld [vmem:[#allocation5 + $0x20] sm:$0xff]  ;;  %v256_v10 = vld [vmem:[#allocation5 + $0x18] sm:$0xff]  ;;  %v403_v16 = vunpack.c.l.s4 %v2586_v15  ;;  %v342_v17 = vshrl.u32 %v341_v14, 7  ;;  %s2587_s2 = smov 96   ;;  %vm506_vm5 = vcmask 154624  }
  0x40   :  { %2152 = vmatprep.subr.mxu0 %v2584_v0  ;;  %2161 = vmatprep.subr.mxu1 %v2584_v0  ;;  %v255_v11 = vld [vmem:[#allocation5 + $0x10] sm:$0xff]  ;;  %v254_v12 = vld [vmem:[#allocation5 + $0x8] sm:$0xff]  ;;  %v253_v13 = vld [vmem:[#allocation5] sm:$0xff]  ;;  %vm513_vm8 = vcmask 149504   ;;  %s2588_s4 = smov 64   ;;  %s2589_s17 = smov 32  }
  0x41   :  { %v404_v18 = vunpack.c.0.s8 %v403_v16  ;;  %v2692_v19 = vsub.s32 0, %v342_v17  ;;  %v373_v21 = vsub.s32 2, %v342_v17  ;;  %v388_v22 = vsub.s32 3, %v342_v17  ;;  %v2722_v48 = vld [vmem:[#allocation10] sm:$0xff]  ;;  %v2724_v56 = vld [vmem:[#allocation10 + $0x10] sm:$0x7] }
  0x42   :  { %v358_v26 = vsub.s32 1, %v342_v17  ;;  %v2727_v59 = vld [vmem:[#allocation10 + $0x8] sm:$0xff]  ;;  %s2590_s18 = smov [#allocation11]  }
  0x43   :  { %2153 = vmatpush3.xpose.msk.msra.mxu0 %vm96_vm1, %v90_v2  ;;  %2162 = vmatpush3.xpose.msk.msra.mxu1 %vm96_vm1, %v90_v2  ;;  %v407_v20 = vsub.s32 %v404_v18, %v342_v17  ;;  %s1981_s19 = sshll.u32 %s2590_s18, 4  ;;  %s1982_s19 = int_to_ptr.vmem [resolvable:$true] %s1981_s19 }
  0x44   :  { %2154 = vmatprep.subr.mxu0 %v2584_v0  ;;  %2163 = vmatprep.subr.mxu1 %v2584_v0  ;;  %s2549_s20 = scalar_lea.vmem %s1982_s19, 384  ;;  %p2554_p12 = scmp.lt.s32.totalorder %s1982_s19, %s1982_s19 }
  0x45   :  { %p2550_p11 = scmp.ne.s32.totalorder %s1982_s19, %s2549_s20  ;;  %p2555_p13 = scmp.lt.s32.totalorder %s2549_s20, %s2549_s20 }
  0x47   :  { %2155 = vmatpush3.xpose.msk.msra.mxu0 %vm96_vm1, %v89_v3  ;;  %2164 = vmatpush3.xpose.msk.msra.mxu1 %vm96_vm1, %v89_v3  ;;  %p2556_p0 = por %p2555_p13, %p2554_p12 }
  0x48   :  { %2168 = vmatprep.subr.mxu0 %v2584_v0  ;;  %2193 = vmatprep.subr.mxu1 %v2584_v0 }
  0x49   :  { %p2557_p1 = pnand %p2556_p0, %p2550_p11 }
  0x4a   :  { %2157 = vmatmul.mubr.msk.f32.vlgmr.msra.gmra.mxu0 %vm96_vm1, %v95_v4  ;;  %2166 = vmatmul.mubr.msk.f32.vlgmr.msra.gmra.mxu1 %vm96_vm1, %v179_v5 }
  0x4b   :  { %2169 = vmatpush3.msra.mxu0 %v260_v6  ;;  %2184 = vmatprep.mubr.msk.f32.mxu0 %vm2585_vm0, %v2584_v0 }
  0x4c   :  { %2170 = vmatprep.subr.mxu0 %v2584_v0  ;;  %2199 = vmatprep.mubr.msk.f32.mxu1 %vm2585_vm0, %v2584_v0 }
  0x4d   :  { %2171 = vmatpush3.msra.mxu0 %v259_v7 }
  0x4e   :  { %2172 = vmatprep.subr.mxu0 %v2584_v0 }
  0x4f   :  { %2173 = vmatpush3.msra.mxu0 %v258_v8 }
  0x50   :  { %2174 = vmatprep.subr.mxu0 %v2584_v0 }
  0x51   :  { %2175 = vmatpush3.msra.mxu0 %v257_v9 }
  0x52   :  { %2176 = vmatprep.subr.mxu0 %v2584_v0 }
  0x53   :  { %2177 = vmatpush3.msra.mxu0 %v256_v10 }
  0x54   :  { %2178 = vmatprep.subr.mxu0 %v2584_v0 }
  0x55   :  { %2179 = vmatpush3.msra.mxu0 %v255_v11 }
  0x56   :  { %2180 = vmatprep.subr.mxu0 %v2584_v0 }
  0x57   :  { %2181 = vmatpush3.msra.mxu0 %v254_v12 }
  0x58   :  { %2182 = vmatprep.subr.mxu0 %v2584_v0 }
  0x59   :  { %2183 = vmatpush3.msra.mxu0 %v253_v13 }
  0x5a   :  { %2185 = vmatmul.mubr.msk.f32.vlgmr.msra.gmra.mxu0 %vm96_vm1, %v89_v3  ;;  %2223 = vmatprep.subr.mxu0 %v2584_v0 }
  0x5b   :  { %2187 = vmatprep.mubr.msk.f32.mxu0 %vm2585_vm0, %v2584_v0 }
  0x5e   :  { %2188 = vmatmul.mubr.msk.f32.gmra.mxu0 %vm96_vm1, %v90_v2 }
  0x5f   :  { %2190 = vmatprep.mubr.msk.f32.mxu0 %vm2585_vm0, %v2584_v0 }
  0x62   :  { %2191 = vmatmul.mubr.msk.f32.gmra.mxu0 %vm96_vm1, %v91_v1 }
  0x63   :  { %2231 = vmatprep.mubr.msk.f32.mxu0 %vm2585_vm0, %v2584_v0 }
 0x10a   :  { %v175_v23 = vpop.f32.mrf.mxu0  ;;  %v249_v24 = vpop.f32.mrf.mxu1 }
 0x10b   :  { %v344_v25 = vrot.slane %v175_v23, %v2692_v19  ;;  %v408_v27 = vrot.slane %v249_v24, %v407_v20  ;;  %v2695_v28 = vrot.slane %v175_v23, %v373_v21  ;;  %v2697_v31 = vrot.slane %v175_v23, %v388_v22 }
 0x10c   :  { %v2158_v29 = vpop.f32.mrf.mxu0  ;;  %v2167_v30 = vpop.f32.mrf.mxu1  ;;  %v359_v34 = vrot.slane %v175_v23, %v358_v26 }
 0x10d   :  { %354 = vbcast.lane.b32.xlu1 %v344_v25, 272  ;;  %346 = vbcast.lane.b32.xlu0 %v344_v25, 256  ;;  %v409_v32 = vcombine.high %v408_v27, %v408_v27  ;;  %v2699_v33 = vrot.slane %v408_v27, %v407_v20 }
 0x10f   :  { %v2701_v35 = vrot.slane %v409_v32, %v407_v20  ;;  %v429_v42 = vrot.slane %v2699_v33, %v2692_v19 }
 0x111   :  { %361 = vbcast.lane.b32.xlu1 %v359_v34, 256  ;;  %350 = vbcast.lane.b32.xlu0 %v344_v25, 264  ;;  %v433_v47 = vrot.slane %v2701_v35, %v2692_v19 }
 0x115   :  { %369 = vbcast.lane.b32.xlu1 %v359_v34, 272  ;;  %365 = vbcast.lane.b32.xlu0 %v359_v34, 264 }
 0x11a   :  { %v2703_v36 = vpop.f32.mrf.mxu0 }
 0x11c   :  { %v2186_v37 = vpop.f32.mrf.mxu0 }
 0x11e   :  { %v2705_v38 = vpop.f32.mrf.mxu0 }
 0x120   :  { %v2189_v39 = vpop.f32.mrf.mxu0 }
 0x122   :  { %v2707_v40 = vpop.f32.mrf.mxu0 }
 0x123   :  { %2194 = vmatpush3.msk.msra.mxu1 %vm641_vm2, %v2707_v40  ;;  %748 = vrot.lane.b32.xlu1 %v2707_v40, %s2587_s2 }
 0x124   :  { %2195 = vmatprep.subr.mxu1 %v2584_v0  ;;  %v2192_v41 = vpop.f32.mrf.mxu0 }
 0x125   :  { %2196 = vmatpush3.msra.mxu1 %v2705_v38  ;;  %v424_v41 = vcombine.high %v2699_v33, %v2699_v33 }
 0x126   :  { %2197 = vmatprep.subr.mxu1 %v2584_v0 }
 0x127   :  { %2198 = vmatpush3.msra.mxu1 %v2703_v36 }
 0x128   :  { %2208 = vmatprep.subr.mxu1 %v2584_v0 }
 0x17f   :  { %v355_v43 = vpop.permute.xlu1 %354  ;;  %v347_v44 = vpop.permute.xlu0 %346 }
 0x180   :  { %v448_v45 = vadd.f32 %v429_v42, %v355_v43  ;;  %v446_v46 = vadd.f32 %v429_v42, %v347_v44 }
 0x182   :  { %vm460_vm3 = vcmp.gt.f32.partialorder %v448_v45, 0.0  ;;  %v472_v49 = vmul.f32 0.2, %v448_v45  ;;  %vm458_vm4 = vcmp.gt.f32.partialorder %v446_v46, 0.0  ;;  %v470_v50 = vmul.f32 0.2, %v446_v46 }
 0x183   :  { %v362_v51 = vpop.permute.xlu1 %361  ;;  %v351_v52 = vpop.permute.xlu0 %350 }
 0x184   :  { %v449_v53 = vadd.f32 %v433_v47, %v362_v51  ;;  %v447_v54 = vadd.f32 %v429_v42, %v351_v52  ;;  %v482_v55 = vsel %vm458_vm4, %v446_v46, %v470_v50  ;;  %v484_v57 = vsel %vm460_vm3, %v448_v45, %v472_v49 }
 0x185   :  { %v494_v58 = vadd.f32 %v482_v55, %v2722_v48  ;;  %v496_v2 = vadd.f32 %v484_v57, %v2724_v56  ;;  %v437_v45 = vrot.slane %v424_v41, %v2692_v19  ;;  %vm860_vm3 = vcmask 261120  }
 0x186   :  { %vm461_vm6 = vcmp.gt.f32.partialorder %v449_v53, 0.0  ;;  %v473_v60 = vmul.f32 0.2, %v449_v53  ;;  %vm459_vm7 = vcmp.gt.f32.partialorder %v447_v54, 0.0  ;;  %v471_v61 = vmul.f32 0.2, %v447_v54 }
 0x187   :  { %v370_v62 = vpop.permute.xlu1 %369  ;;  %v366_v63 = vpop.permute.xlu0 %365  ;;  %v507_v1 = vsel %vm506_vm5, %v494_v58, -inf  ;;  %v514_v10 = vsel %vm513_vm8, %v496_v2, -inf  ;;  %vm967_vm4 = vcmask 256000  }
 0x188   :  { %v451_v3 = vadd.f32 %v433_v47, %v370_v62  ;;  %v450_v4 = vadd.f32 %v433_v47, %v366_v63  ;;  %508 = vmax.xlane.f32.xlu0 %v507_v1  ;;  %v483_v5 = vsel %vm459_vm7, %v447_v54, %v471_v61  ;;  %v485_v6 = vsel %vm461_vm6, %v449_v53, %v473_v60 }
 0x189   :  { %v495_v7 = vadd.f32 %v483_v5, %v2727_v59  ;;  %v497_v12 = vadd.f32 %v485_v6, %v2722_v48 }
 0x18a   :  { %vm463_vm9 = vcmp.gt.f32.partialorder %v451_v3, 0.0  ;;  %v475_v8 = vmul.f32 0.2, %v451_v3  ;;  %vm462_vm10 = vcmp.gt.f32.partialorder %v450_v4, 0.0  ;;  %v474_v9 = vmul.f32 0.2, %v450_v4 }
 0x18b   :  { %v510_v11 = vsel %vm506_vm5, %v495_v7, -inf  ;;  %v517_v16 = vsel %vm506_vm5, %v497_v12, -inf }
 0x18c   :  { %515 = vmax.xlane.f32.xlu0 %v514_v10  ;;  %511 = vmax.xlane.f32.xlu1 %v510_v11  ;;  %v486_v13 = vsel %vm462_vm10, %v450_v4, %v474_v9  ;;  %v487_v14 = vsel %vm463_vm9, %v451_v3, %v475_v8 }
 0x18d   :  { %v498_v15 = vadd.f32 %v486_v13, %v2727_v59  ;;  %v499_v18 = vadd.f32 %v487_v14, %v2724_v56 }
 0x18f   :  { %v520_v17 = vsel %vm506_vm5, %v498_v15, -inf  ;;  %v523_v20 = vsel %vm513_vm8, %v499_v18, -inf }
 0x190   :  { %518 = vmax.xlane.f32.xlu0 %v517_v16  ;;  %521 = vmax.xlane.f32.xlu1 %v520_v17 }
 0x194   :  { %524 = vmax.xlane.f32.xlu0 %v523_v20  ;;  %v2792_v20 = vld [vmem:[#allocation8 + $0x8] ss:$0 sm:$0xff] }
 0x195   :  { %v749_v21 = vpop.permute.xlu1 %748 }
 0x1a1   :  { %744 = vrot.lane.b32.xlu1 %v2703_v36, %s2587_s2 }
 0x1a5   :  { %376 = vbcast.lane.b32.xlu1 %v2695_v28, 256 }
 0x1a9   :  { %384 = vbcast.lane.b32.xlu1 %v2695_v28, 272 }
 0x1aa   :  { %746 = vrot.lane.b32.xlu0 %v2705_v38, %s2587_s2 }
 0x1ae   :  { %380 = vbcast.lane.b32.xlu0 %v2695_v28, 264 }
 0x211   :  { %v509_v22 = vpop.xlane.xlu0 %508 }
 0x212   :  { %v544_v23 = vsub.f32 %v494_v58, %v509_v22  ;;  %v858_v22 = vld [vmem:[#allocation7 + $0x30] sm:$0xff] }
 0x214   :  { %v556_v24 = vmul.f32 1.442695, %v544_v23  ;;  %v857_v23 = vld [vmem:[#allocation7 + $0x28] sm:$0xff] }
 0x215   :  { %v516_v25 = vpop.xlane.xlu0 %515  ;;  %v512_v26 = vpop.xlane.xlu1 %511 }
 0x216   :  { %2386 = vpow2.f32 %v556_v24  ;;  %v545_v27 = vsub.f32 %v495_v7, %v512_v26  ;;  %v546_v29 = vsub.f32 %v496_v2, %v516_v25  ;;  %v856_v24 = vld [vmem:[#allocation7 + $0x20] sm:$0xff] }
 0x218   :  { %v558_v30 = vmul.f32 1.442695, %v545_v27  ;;  %v560_v39 = vmul.f32 1.442695, %v546_v29 }
 0x219   :  { %v519_v32 = vpop.xlane.xlu0 %518  ;;  %v522_v34 = vpop.xlane.xlu1 %521 }
 0x21a   :  { %v547_v37 = vsub.f32 %v497_v12, %v519_v32  ;;  %2388 = vpow2.f32 %v558_v30  ;;  %v548_v44 = vsub.f32 %v498_v15, %v522_v34 }
 0x21c   :  { %v562_v42 = vmul.f32 1.442695, %v547_v37  ;;  %v564_v51 = vmul.f32 1.442695, %v548_v44 }
 0x21d   :  { %v525_v28 = vpop.xlane.xlu0 %524  ;;  %v745_v43 = vpop.permute.xlu1 %744 }
 0x21e   :  { %2390 = vpow2.f32 %v562_v42  ;;  %v549_v52 = vsub.f32 %v499_v18, %v525_v28 }
 0x21f   :  { %2392 = vpow2.f32 %v560_v39 }
 0x220   :  { %2394 = vpow2.f32 %v564_v51  ;;  %v566_v60 = vmul.f32 1.442695, %v549_v52 }
 0x221   :  { %v747_v46 = vpop.permute.xlu0 %746  ;;  %v377_v47 = vpop.permute.xlu1 %376 }
 0x222   :  { %v452_v49 = vadd.f32 %v437_v45, %v377_v47  ;;  %2396 = vpow2.f32 %v566_v60 }
 0x223   :  { %v2387_v50 = vpop.eup %2386 }
 0x224   :  { %vm464_vm11 = vcmp.gt.f32.partialorder %v452_v49, 0.0  ;;  %v476_v53 = vmul.f32 0.2, %v452_v49  ;;  %2200 = vmatmul.mubr.msk.f32.vlgmr.msra.gmra.mxu1 %vm506_vm5, %v2387_v50  ;;  %v580_v15 = vsel %vm506_vm5, %v2387_v50, 0.0 }
 0x225   :  { %2209 = vmatpush3.msk.msra.mxu1 %vm641_vm2, %v749_v21  ;;  %v381_v33 = vpop.permute.xlu0 %380  ;;  %v385_v54 = vpop.permute.xlu1 %384  ;;  %2202 = vmatprep.mubr.msk.f32.mxu1 %vm2585_vm0, %v2584_v0  ;;  %v859_v21 = vld [vmem:[#allocation7 + $0x38] sm:$0xff] }
 0x226   :  { %v453_v55 = vadd.f32 %v437_v45, %v381_v33  ;;  %v454_v57 = vadd.f32 %v437_v45, %v385_v54  ;;  %2210 = vmatprep.subr.mxu1 %v2584_v0  ;;  %v488_v58 = vsel %vm464_vm11, %v452_v49, %v476_v53  ;;  %2224 = vmatpush3.msra.mxu0 %v859_v21 }
 0x227   :  { %2211 = vmatpush3.msra.mxu1 %v747_v46  ;;  %v2756_v61 = vadd.f32 %v488_v58, %v2722_v48  ;;  %v2389_v62 = vpop.eup %2388  ;;  %2225 = vmatprep.subr.mxu0 %v2584_v0  ;;  %v425_v46 = vcombine.high %v2701_v35, %v2701_v35 }
 0x228   :  { %vm465_vm12 = vcmp.gt.f32.partialorder %v453_v55, 0.0  ;;  %v477_v63 = vmul.f32 0.2, %v453_v55  ;;  %vm466_vm13 = vcmp.gt.f32.partialorder %v454_v57, 0.0  ;;  %v478_v1 = vmul.f32 0.2, %v454_v57  ;;  %2212 = vmatprep.subr.mxu1 %v2584_v0  ;;  %2203 = vmatmul.mubr.msk.f32.gmra.mxu1 %vm506_vm5, %v2389_v62 }
 0x229   :  { %v526_v2 = vsel %vm506_vm5, %v2756_v61, -inf  ;;  %2213 = vmatpush3.msra.mxu1 %v745_v43  ;;  %2205 = vmatprep.mubr.msk.f32.mxu1 %vm2585_vm0, %v2584_v0  ;;  %v583_v14 = vsel %vm506_vm5, %v2389_v62, 0.0  ;;  %v441_v53 = vrot.slane %v425_v46, %v2692_v19 }
 0x22a   :  { %527 = vmax.xlane.f32.xlu1 %v526_v2  ;;  %v489_v3 = vsel %vm465_vm12, %v453_v55, %v477_v63  ;;  %v490_v4 = vsel %vm466_vm13, %v454_v57, %v478_v1  ;;  %2240 = vmatprep.subr.mxu1 %v2584_v0 }
 0x22b   :  { %v2391_v5 = vpop.eup %2390  ;;  %v501_v6 = vadd.f32 %v489_v3, %v2727_v59  ;;  %v502_v10 = vadd.f32 %v490_v4, %v2724_v56  ;;  %2226 = vmatpush3.msra.mxu0 %v858_v22 }
 0x22c   :  { %v2393_v7 = vpop.eup %2392  ;;  %v589_v8 = vsel %vm506_vm5, %v2391_v5, 0.0  ;;  %2227 = vmatprep.subr.mxu0 %v2584_v0 }
 0x22d   :  { %2206 = vmatmul.mubr.msk.f32.gmra.mxu1 %vm506_vm5, %v2393_v7  ;;  %v529_v9 = vsel %vm506_vm5, %v501_v6, -inf  ;;  %v586_v11 = vsel %vm513_vm8, %v2393_v7, 0.0  ;;  %v532_v12 = vsel %vm513_vm8, %v502_v10, -inf  ;;  %v2395_v13 = vpop.eup %2394  ;;  %2228 = vmatpush3.msra.mxu0 %v857_v23 }
 0x22e   :  { %530 = vmax.xlane.f32.xlu0 %v529_v9  ;;  %590 = vadd.xlane.f32.xlu1 %v589_v8  ;;  %v592_v17 = vsel %vm506_vm5, %v2395_v13, 0.0 }
 0x22f   :  { %2214 = vmatprep.mubr.msk.f32.mxu1 %vm2585_vm0, %v2584_v0  ;;  %v2397_v16 = vpop.eup %2396  ;;  %2229 = vmatprep.subr.mxu0 %v2584_v0 }
 0x230   :  { %v595_v18 = vsel %vm513_vm8, %v2397_v16, 0.0  ;;  %2230 = vmatpush3.msra.mxu0 %v856_v24 }
 0x231   :  { %2215 = vmatmul.mubr.msk.f32.vlgmr.msra.gmra.mxu1 %vm506_vm5, %v2391_v5  ;;  %2266 = vmatprep.subr.mxu0 %v2584_v0 }
 0x232   :  { %587 = vadd.xlane.f32.xlu0 %v586_v11  ;;  %533 = vmax.xlane.f32.xlu1 %v532_v12  ;;  %v2841_v11 = vld [vmem:[#allocation8 + $0xb] sm:$0x1] }
 0x233   :  { %2217 = vmatprep.mubr.msk.f32.mxu1 %vm2585_vm0, %v2584_v0 }
 0x235   :  { %2218 = vmatmul.mubr.msk.f32.gmra.mxu1 %vm506_vm5, %v2395_v13 }
 0x236   :  { %584 = vadd.xlane.f32.xlu0 %v583_v14  ;;  %581 = vadd.xlane.f32.xlu1 %v580_v15 }
 0x237   :  { %2220 = vmatprep.mubr.msk.f32.mxu1 %vm2585_vm0, %v2584_v0 }
 0x239   :  { %2221 = vmatmul.mubr.msk.f32.gmra.mxu1 %vm506_vm5, %v2397_v16 }
 0x23a   :  { %593 = vadd.xlane.f32.xlu0 %v592_v17  ;;  %2246 = vmatprep.mubr.msk.f32.mxu1 %vm2585_vm0, %v2584_v0 }
 0x23e   :  { %596 = vadd.xlane.f32.xlu0 %v595_v18 }
 0x247   :  { %1226 = vrot.lane.b32.xlu1 %v2707_v40, %s2588_s4 }
 0x24b   :  { %1224 = vrot.lane.b32.xlu1 %v2705_v38, %s2588_s4 }
 0x24f   :  { %391 = vbcast.lane.b32.xlu1 %v2697_v31, 256 }
 0x253   :  { %399 = vbcast.lane.b32.xlu1 %v2697_v31, 272 }
 0x254   :  { %847 = vrot.lane.b32.xlu0 %v2792_v20, %s2587_s2 }
 0x258   :  { %1222 = vrot.lane.b32.xlu0 %v2703_v36, %s2588_s4 }
 0x25c   :  { %395 = vbcast.lane.b32.xlu0 %v2697_v31, 264 }
 0x2b3   :  { %v528_v25 = vpop.xlane.xlu1 %527 }
 0x2b4   :  { %v550_v26 = vsub.f32 %v2756_v61, %v528_v25 }
 0x2b6   :  { %v568_v31 = vmul.f32 1.442695, %v550_v26 }
 0x2b7   :  { %v531_v27 = vpop.xlane.xlu0 %530  ;;  %v591_v29 = vpop.xlane.xlu1 %590 }
 0x2b8   :  { %2398 = vpow2.f32 %v568_v31  ;;  %v551_v30 = vsub.f32 %v501_v6, %v531_v27 }
 0x2ba   :  { %v570_v32 = vmul.f32 1.442695, %v551_v30 }
 0x2bb   :  { %v588_v34 = vpop.xlane.xlu0 %587  ;;  %v534_v37 = vpop.xlane.xlu1 %533 }
 0x2bc   :  { %2400 = vpow2.f32 %v570_v32  ;;  %v552_v39 = vsub.f32 %v502_v10, %v534_v37 }
 0x2be   :  { %v572_v41 = vmul.f32 1.442695, %v552_v39 }
 0x2bf   :  { %v585_v42 = vpop.xlane.xlu0 %584  ;;  %v582_v28 = vpop.xlane.xlu1 %581 }
 0x2c0   :  { %2402 = vpow2.f32 %v572_v41 }
 0x2c1   :  { %2404 = vrcp.f32 %v588_v34 }
 0x2c2   :  { %2406 = vrcp.f32 %v591_v29 }
 0x2c3   :  { %v594_v43 = vpop.xlane.xlu0 %593  ;;  %v2805_v44 = vpop.permute.xlu1 %1226  ;;  %2408 = vrcp.f32 %v585_v42 }
 0x2c4   :  { %2410 = vrcp.f32 %v594_v43 }
 0x2c5   :  { %v2807_v45 = vpop.eup %2398  ;;  %2412 = vrcp.f32 %v582_v28 }
 0x2c6   :  { %v598_v47 = vsel %vm506_vm5, %v2807_v45, 0.0 }
 0x2c7   :  { %v597_v49 = vpop.xlane.xlu0 %596  ;;  %599 = vadd.xlane.f32.xlu0 %v598_v47  ;;  %v2813_v50 = vpop.permute.xlu1 %1224 }
 0x2c8   :  { %2414 = vrcp.f32 %v597_v49 }
 0x2c9   :  { %v2815_v51 = vpop.eup %2400 }
 0x2ca   :  { %v601_v52 = vsel %vm506_vm5, %v2815_v51, 0.0 }
 0x2cb   :  { %v2820_v33 = vpop.permute.xlu0 %847  ;;  %602 = vadd.xlane.f32.xlu0 %v601_v52  ;;  %v392_v54 = vpop.permute.xlu1 %391 }
 0x2cc   :  { %v455_v55 = vadd.f32 %v441_v53, %v392_v54 }
 0x2cd   :  { %v2822_v35 = vpop.eup %2402 }
 0x2ce   :  { %vm467_vm14 = vcmp.gt.f32.partialorder %v455_v55, 0.0  ;;  %v479_v57 = vmul.f32 0.2, %v455_v55  ;;  %v604_v58 = vsel %vm513_vm8, %v2822_v35, 0.0  ;;  %v2405_v16 = vpop.eup %2404 }
 0x2cf   :  { %v2826_v60 = vpop.permute.xlu0 %1222  ;;  %605 = vadd.xlane.f32.xlu1 %v604_v58  ;;  %v400_v61 = vpop.permute.xlu1 %399  ;;  %v738_v58 = vld [vmem:[#allocation7] sm:$0xff] }
 0x2d0   :  { %v457_v62 = vadd.f32 %v441_v53, %v400_v61  ;;  %v491_v63 = vsel %vm467_vm14, %v455_v55, %v479_v57  ;;  %v2407_v21 = vpop.eup %2406  ;;  %v740_v57 = vld [vmem:[#allocation7 + $0x10] sm:$0xff] }
 0x2d1   :  { %v2829_v1 = vadd.f32 %v491_v63, %v2722_v48  ;;  %v2409_v23 = vpop.eup %2408  ;;  %v1334_v63 = vld [vmem:[#allocation7 + $0x48] sm:$0xff] }
 0x2d2   :  { %v481_v4 = vmul.f32 0.2, %v457_v62  ;;  %vm469_vm15 = vcmp.gt.f32.partialorder %v457_v62, 0.0  ;;  %v2411_v27 = vpop.eup %2410 }
 0x2d3   :  { %v396_v2 = vpop.permute.xlu0 %395  ;;  %v535_v3 = vsel %vm506_vm5, %v2829_v1, -inf }
 0x2d4   :  { %v456_v5 = vadd.f32 %v441_v53, %v396_v2  ;;  %536 = vmax.xlane.f32.xlu1 %v535_v3  ;;  %v493_v8 = vsel %vm469_vm15, %v457_v62, %v481_v4  ;;  %v1335_v62 = vld [vmem:[#allocation7 + $0x50] sm:$0xff]  ;;  %v1333_v3 = vld [vmem:[#allocation7 + $0x40] sm:$0xff] }
 0x2d5   :  { %v2839_v48 = vadd.f32 %v493_v8, %v2724_v56 }
 0x2d6   :  { %vm468_vm1 = vcmp.gt.f32.partialorder %v456_v5, 0.0  ;;  %v480_v6 = vmul.f32 0.2, %v456_v5 }
 0x2d7   :  { %v541_v12 = vsel %vm513_vm8, %v2839_v48, -inf }
 0x2d8   :  { %v492_v7 = vsel %vm468_vm1, %v456_v5, %v480_v6 }
 0x2d9   :  { %v2834_v9 = vadd.f32 %v492_v7, %v2727_v59 }
 0x2db   :  { %v538_v10 = vsel %vm506_vm5, %v2834_v9, -inf }
 0x2dc   :  { %539 = vmax.xlane.f32.xlu1 %v538_v10 }
 0x2e0   :  { %542 = vmax.xlane.f32.xlu1 %v541_v12 }
 0x2e1   :  { %972 = vrot.lane.b32.xlu0 %v2841_v11, %s2587_s2 }
 0x2e4   :  { %v711_v59 = vpop.f32.mrf.mxu1 }
 0x2e5   :  { %1441 = vrot.lane.b32.xlu0 %v2841_v11, %s2588_s4 }
 0x2e6   :  { %v2201_v13 = vpop.f32.mrf.mxu1 }
 0x2e8   :  { %v716_v56 = vpop.f32.mrf.mxu1 }
 0x2e9   :  { %1526 = vrot.lane.b32.xlu0 %v2707_v40, %s2589_s17  ;;  %v726_v25 = vmul.f32 %v2409_v23, %v716_v56 }
 0x2ea   :  { %v2204_v14 = vpop.f32.mrf.mxu1 }
 0x2eb   :  { %v733_v37 = vadd.f32 %v2792_v20, %v726_v25  ;;  %v2018_v14 = vld [vmem:[#allocation8 + $0xa] ss:$0 sm:$0xff] }
 0x2ed   :  { %v721_v15 = vpop.f32.mrf.mxu1  ;;  %1524 = vrot.lane.b32.xlu0 %v2705_v38, %s2589_s17  ;;  %v2413_v38 = vpop.eup %2412  ;;  %v2875_v49 = vmax.f32 %v733_v37, 0.0 }
 0x2ee   :  { %v727_v17 = vmul.f32 %v2405_v16, %v721_v15  ;;  %v725_v34 = vmul.f32 %v2413_v38, %v711_v59  ;;  %v2415_v28 = vpop.eup %2414 }
 0x2ef   :  { %v2207_v18 = vpop.f32.mrf.mxu1 }
 0x2f0   :  { %v734_v26 = vadd.f32 %v2792_v20, %v727_v17  ;;  %v732_v47 = vadd.f32 %v2792_v20, %v725_v34  ;;  %v1136_v17 = vmul.f32 %v2018_v14, %v2875_v49 }
 0x2f1   :  { %v829_v22 = vpop.f32.mrf.mxu1  ;;  %1324 = vrot.lane.b32.xlu1 %v2792_v20, %s2588_s4 }
 0x2f2   :  { %v843_v24 = vmul.f32 %v2407_v21, %v829_v22  ;;  %v2862_v39 = vmax.f32 %v734_v26, 0.0  ;;  %v2887_v55 = vmax.f32 %v732_v47, 0.0 }
 0x2f3   :  { %v2216_v40 = vpop.f32.mrf.mxu1 }
 0x2f4   :  { %v850_v31 = vadd.f32 %v2820_v33, %v843_v24  ;;  %v1135_v15 = vmul.f32 %v2018_v14, %v2887_v55  ;;  %v1137_v21 = vmul.f32 %v2018_v14, %v2862_v39 }
 0x2f5   :  { %v834_v29 = vpop.f32.mrf.mxu1  ;;  %1522 = vrot.lane.b32.xlu1 %v2703_v36, %s2589_s17 }
 0x2f6   :  { %v2859_v30 = vmax.f32 %v850_v31, 0.0  ;;  %v844_v32 = vmul.f32 %v2411_v27, %v834_v29  ;;  %v1138_v16 = vsel %vm860_vm3, %v1135_v15, 0.0 }
 0x2f7   :  { %v2219_v41 = vpop.f32.mrf.mxu1 }
 0x2f8   :  { %v851_v42 = vadd.f32 %v2820_v33, %v844_v32  ;;  %2232 = vmatmul.mubr.msk.f32.vlgmr.msra.gmra.mxu0 %vm860_vm3, %v2859_v30 }
 0x2f9   :  { %2267 = vmatpush3.xpose.msk.msra.mxu0 %vm860_vm3, %v2862_v39  ;;  %v839_v36 = vpop.f32.mrf.mxu1  ;;  %2234 = vmatprep.mubr.msk.f32.mxu0 %vm2585_vm0, %v2584_v0 }
 0x2fa   :  { %v2871_v43 = vmax.f32 %v851_v42, 0.0  ;;  %v845_v46 = vmul.f32 %v2415_v28, %v839_v36  ;;  %2268 = vmatprep.subr.mxu0 %v2584_v0 }
 0x2fb   :  { %v2222_v52 = vpop.f32.mrf.mxu1 }
 0x2fc   :  { %v852_v53 = vadd.f32 %v2820_v33, %v845_v46  ;;  %2235 = vmatmul.mubr.msk.f32.gmra.mxu0 %vm860_vm3, %v2871_v43 }
 0x2fd   :  { %2269 = vmatpush3.xpose.msk.msra.mxu0 %vm860_vm3, %v2875_v49  ;;  %2237 = vmatprep.mubr.msk.f32.mxu0 %vm2585_vm0, %v2584_v0 }
 0x2fe   :  { %v2884_v54 = vmax.f32 %v852_v53, 0.0  ;;  %2270 = vmatprep.subr.mxu0 %v2584_v0 }
 0x300   :  { %2238 = vmatmul.mubr.msk.f32.gmra.mxu0 %vm860_vm3, %v2884_v54  ;;  %2241 = vmatpush3.xpose.msk.msra.mxu1 %vm860_vm3, %v2884_v54 }
 0x301   :  { %2271 = vmatpush3.xpose.msk.msra.mxu0 %vm860_vm3, %v2887_v55  ;;  %2242 = vmatprep.subr.mxu1 %v2584_v0 }
 0x302   :  { %2272 = vmatprep.mubr.msk.f32.mxu0 %vm2585_vm0, %v2584_v0  ;;  %2275 = vmatprep.subr.mxu0 %v2584_v0 }
 0x304   :  { %2243 = vmatpush3.xpose.msk.msra.mxu1 %vm860_vm3, %v2871_v43  ;;  %2273 = vmatmul.mubr.msk.f32.vlgmr.msra.gmra.mxu0 %vm860_vm3, %v2841_v11 }
 0x305   :  { %2276 = vmatpush3.msk.msra.mxu0 %vm641_vm2, %v2805_v44  ;;  %2244 = vmatprep.subr.mxu1 %v2584_v0 }
 0x306   :  { %2277 = vmatprep.subr.mxu0 %v2584_v0  ;;  %2281 = vmatprep.mubr.msk.f32.mxu0 %vm2585_vm0, %v2584_v0 }
 0x307   :  { %2278 = vmatpush3.msra.mxu0 %v2813_v50  ;;  %v741_v50 = vld [vmem:[#allocation7 + $0x18] sm:$0xff] }
 0x308   :  { %2279 = vmatprep.subr.mxu0 %v2584_v0  ;;  %2245 = vmatpush3.xpose.msk.msra.mxu1 %vm860_vm3, %v2859_v30 }
 0x309   :  { %2280 = vmatpush3.msra.mxu0 %v2826_v60  ;;  %2249 = vmatprep.subr.mxu1 %v2584_v0  ;;  %v1336_v60 = vld [vmem:[#allocation7 + $0x58] sm:$0xff] }
 0x30a   :  { %2282 = vmatmul.mubr.msk.f32.vlgmr.msra.gmra.mxu0 %vm506_vm5, %v2807_v45  ;;  %2331 = vmatprep.subr.mxu0 %v2584_v0 }
 0x30b   :  { %2284 = vmatprep.mubr.msk.f32.mxu0 %vm2585_vm0, %v2584_v0 }
 0x30e   :  { %2285 = vmatmul.mubr.msk.f32.gmra.mxu0 %vm506_vm5, %v2815_v51 }
 0x30f   :  { %2287 = vmatprep.mubr.msk.f32.mxu0 %vm2585_vm0, %v2584_v0 }
 0x312   :  { %2288 = vmatmul.mubr.msk.f32.gmra.mxu0 %vm506_vm5, %v2822_v35  ;;  %v739_v35 = vld [vmem:[#allocation7 + $0x8] sm:$0xff] }
 0x313   :  { %2339 = vmatprep.mubr.msk.f32.mxu0 %vm2585_vm0, %v2584_v0 }
 0x350   :  { %v2928_v44 = vpop.xlane.xlu0 %599 }
 0x354   :  { %v2930_v45 = vpop.xlane.xlu0 %602 }
 0x358   :  { %v973_v33 = vpop.permute.xlu0 %972  ;;  %v2935_v51 = vpop.xlane.xlu1 %605 }
 0x359   :  { %2247 = vmatmul.mubr.msk.f32.vlgmr.msra.gmra.mxu1 %vm860_vm3, %v973_v33 }
 0x35a   :  { %2250 = vmatpush3.msra.mxu1 %v741_v50  ;;  %2257 = vmatprep.mubr.msk.f32.mxu1 %vm2585_vm0, %v2584_v0 }
 0x35b   :  { %2251 = vmatprep.subr.mxu1 %v2584_v0 }
 0x35c   :  { %2252 = vmatpush3.msra.mxu1 %v740_v57  ;;  %v1442_v50 = vpop.permute.xlu0 %1441 }
 0x35d   :  { %2253 = vmatprep.subr.mxu1 %v2584_v0  ;;  %v537_v61 = vpop.xlane.xlu1 %536 }
 0x35e   :  { %2254 = vmatpush3.msra.mxu1 %v739_v35  ;;  %v553_v5 = vsub.f32 %v2829_v1, %v537_v61 }
 0x35f   :  { %2255 = vmatprep.subr.mxu1 %v2584_v0 }
 0x360   :  { %2256 = vmatpush3.msra.mxu1 %v738_v58  ;;  %v1527_v33 = vpop.permute.xlu0 %1526 }
 0x361   :  { %2258 = vmatmul.mubr.msk.f32.vlgmr.msra.gmra.mxu1 %vm860_vm3, %v2887_v55  ;;  %2290 = vmatprep.subr.mxu1 %v2584_v0 }
 0x362   :  { %2260 = vmatprep.mubr.msk.f32.mxu1 %vm2585_vm0, %v2584_v0  ;;  %2291 = vmatpush3.msra.mxu1 %v1336_v60 }
 0x363   :  { %2292 = vmatprep.subr.mxu1 %v2584_v0 }
 0x364   :  { %2293 = vmatpush3.msra.mxu1 %v1335_v62  ;;  %v1525_v57 = vpop.permute.xlu0 %1524 }
 0x365   :  { %2261 = vmatmul.mubr.msk.f32.gmra.mxu1 %vm860_vm3, %v2875_v49  ;;  %v540_v2 = vpop.xlane.xlu1 %539  ;;  %2294 = vmatprep.subr.mxu1 %v2584_v0 }
 0x366   :  { %v554_v4 = vsub.f32 %v2834_v9, %v540_v2  ;;  %2263 = vmatprep.mubr.msk.f32.mxu1 %vm2585_vm0, %v2584_v0  ;;  %2295 = vmatpush3.msra.mxu1 %v1334_v63  ;;  %v574_v9 = vmul.f32 1.442695, %v553_v5 }
 0x367   :  { %2296 = vmatprep.subr.mxu1 %v2584_v0 }
 0x368   :  { %v576_v6 = vmul.f32 1.442695, %v554_v4  ;;  %2297 = vmatpush3.msra.mxu1 %v1333_v3 }
 0x369   :  { %2264 = vmatmul.mubr.msk.f32.gmra.mxu1 %vm860_vm3, %v2862_v39  ;;  %v543_v7 = vpop.xlane.xlu1 %542  ;;  %2307 = vmatprep.subr.mxu1 %v2584_v0 }
 0x36a   :  { %2416 = vpow2.f32 %v576_v6  ;;  %v555_v8 = vsub.f32 %v2839_v48, %v543_v7  ;;  %2298 = vmatprep.mubr.msk.f32.mxu1 %vm2585_vm0, %v2584_v0 }
 0x36c   :  { %v578_v10 = vmul.f32 1.442695, %v555_v8 }
 0x36d   :  { %v1325_v32 = vpop.permute.xlu1 %1324 }
 0x36e   :  { %2418 = vpow2.f32 %v578_v10 }
 0x36f   :  { %2420 = vpow2.f32 %v574_v9 }
 0x370   :  { %2422 = vrcp.f32 %v2928_v44 }
 0x371   :  { %2424 = vrcp.f32 %v2930_v45 }
 0x372   :  { %2426 = vrcp.f32 %v2935_v51  ;;  %v1523_v51 = vpop.permute.xlu1 %1522 }
 0x377   :  { %v2960_v12 = vpop.eup %2416 }
 0x378   :  { %v610_v1 = vsel %vm506_vm5, %v2960_v12, 0.0 }
 0x379   :  { %611 = vadd.xlane.f32.xlu1 %v610_v1 }
 0x37b   :  { %v2964_v59 = vpop.eup %2418 }
 0x37c   :  { %v613_v13 = vsel %vm513_vm8, %v2964_v59, 0.0  ;;  %v2968_v56 = vpop.eup %2420 }
 0x37d   :  { %614 = vadd.xlane.f32.xlu0 %v613_v13  ;;  %v607_v48 = vsel %vm506_vm5, %v2968_v56, 0.0  ;;  %v2423_v27 = vpop.eup %2422 }
 0x37e   :  { %v2425_v39 = vpop.eup %2424 }
 0x37f   :  { %v2427_v47 = vpop.eup %2426 }
 0x381   :  { %608 = vadd.xlane.f32.xlu0 %v607_v48 }
 0x38a   :  { %1741 = vrot.lane.b32.xlu1 %v2841_v11, %s2589_s17  ;;  %v1142_v11 = vsel %vm860_vm3, %v1136_v17, 0.0 }
 0x38e   :  { %955 = vrot.lane.b32.xlu1 %v2018_v14, %s2587_s2 }
 0x392   :  { %1726 = vrot.lane.b32.xlu1 %v2018_v14, %s2589_s17 }
 0x397   :  { %1624 = vrot.lane.b32.xlu0 %v2792_v20, %s2589_s17  ;;  %v1146_v20 = vsel %vm967_vm4, %v1137_v21, 0.0  ;;  %v1634_v21 = vld [vmem:[#allocation7 + $0x68] sm:$0xff] }
 0x39b   :  { %1426 = vrot.lane.b32.xlu0 %v2018_v14, %s2588_s4 }
 0x3b6   :  { %1139 = vadd.xlane.f32.xlu1 %v1138_v16  ;;  %v1636_v16 = vld [vmem:[#allocation7 + $0x78] sm:$0xff] }
 0x3b7   :  { %2332 = vmatpush3.msra.mxu0 %v1636_v16 }
 0x3b8   :  { %v2982_v18 = vpop.f32.mrf.mxu0  ;;  %2333 = vmatprep.subr.mxu0 %v2584_v0 }
 0x3ba   :  { %v2233_v22 = vpop.f32.mrf.mxu0  ;;  %1143 = vadd.xlane.f32.xlu1 %v1142_v11  ;;  %v1635_v11 = vld [vmem:[#allocation7 + $0x70] sm:$0xff] }
 0x3bb   :  { %2334 = vmatpush3.msra.mxu0 %v1635_v11  ;;  %v1633_v22 = vld [vmem:[#allocation7 + $0x60] sm:$0xff] }
 0x3bc   :  { %v2986_v23 = vpop.f32.mrf.mxu0  ;;  %2335 = vmatprep.subr.mxu0 %v2584_v0 }
 0x3bd   :  { %2336 = vmatpush3.msra.mxu0 %v1634_v21 }
 0x3be   :  { %v2236_v24 = vpop.f32.mrf.mxu0  ;;  %1147 = vadd.xlane.f32.xlu1 %v1146_v20  ;;  %2337 = vmatprep.subr.mxu0 %v2584_v0 }
 0x3bf   :  { %2338 = vmatpush3.msra.mxu0 %v1633_v22 }
 0x3c0   :  { %v2990_v25 = vpop.f32.mrf.mxu0  ;;  %2357 = vmatprep.subr.mxu0 %v2584_v0 }
 0x3c2   :  { %v2239_v26 = vpop.f32.mrf.mxu0 }
 0x3c4   :  { %v2993_v40 = vpop.f32.mrf.mxu0 }
 0x3c6   :  { %v2274_v31 = vpop.f32.mrf.mxu0 }
 0x3ca   :  { %v1307_v29 = vpop.f32.mrf.mxu0 }
 0x3cb   :  { %v1321_v38 = vmul.f32 %v2423_v27, %v1307_v29 }
 0x3cc   :  { %v2283_v34 = vpop.f32.mrf.mxu0 }
 0x3cd   :  { %v1327_v37 = vadd.f32 %v1325_v32, %v1321_v38 }
 0x3ce   :  { %v1312_v41 = vpop.f32.mrf.mxu0 }
 0x3cf   :  { %v1330_v42 = vmax.f32 %v1327_v37, 0.0  ;;  %v1322_v28 = vmul.f32 %v2425_v39, %v1312_v41 }
 0x3d0   :  { %v2286_v36 = vpop.f32.mrf.mxu0 }
 0x3d1   :  { %v1328_v46 = vadd.f32 %v1325_v32, %v1322_v28  ;;  %2299 = vmatmul.mubr.msk.f32.vlgmr.msra.gmra.mxu1 %vm860_vm3, %v1330_v42 }
 0x3d2   :  { %v1317_v49 = vpop.f32.mrf.mxu0  ;;  %2301 = vmatprep.mubr.msk.f32.mxu1 %vm2585_vm0, %v2584_v0 }
 0x3d3   :  { %v1331_v52 = vmax.f32 %v1328_v46, 0.0  ;;  %v1323_v53 = vmul.f32 %v2427_v47, %v1317_v49 }
 0x3d4   :  { %v2289_v55 = vpop.f32.mrf.mxu0 }
 0x3d5   :  { %v1329_v44 = vadd.f32 %v1325_v32, %v1323_v53  ;;  %2302 = vmatmul.mubr.msk.f32.gmra.mxu1 %vm860_vm3, %v1331_v52 }
 0x3d6   :  { %2304 = vmatprep.mubr.msk.f32.mxu1 %vm2585_vm0, %v2584_v0 }
 0x3d7   :  { %v1332_v45 = vmax.f32 %v1329_v44, 0.0 }
 0x3d9   :  { %2305 = vmatmul.mubr.msk.f32.gmra.mxu1 %vm860_vm3, %v1332_v45 }
 0x3da   :  { %2308 = vmatpush3.xpose.msk.msra.mxu1 %vm860_vm3, %v1332_v45  ;;  %2313 = vmatprep.mubr.msk.f32.mxu1 %vm2585_vm0, %v2584_v0 }
 0x3db   :  { %2309 = vmatprep.subr.mxu1 %v2584_v0 }
 0x3de   :  { %2310 = vmatpush3.xpose.msk.msra.mxu1 %vm860_vm3, %v1331_v52 }
 0x3df   :  { %2311 = vmatprep.subr.mxu1 %v2584_v0 }
 0x3e2   :  { %2312 = vmatpush3.xpose.msk.msra.mxu1 %vm860_vm3, %v1330_v42 }
 0x3e3   :  { %2316 = vmatprep.subr.mxu1 %v2584_v0 }
 0x3e5   :  { %2314 = vmatmul.mubr.msk.f32.vlgmr.msra.gmra.mxu1 %vm860_vm3, %v1442_v50 }
 0x3e6   :  { %2317 = vmatpush3.msk.msra.mxu1 %vm641_vm2, %v1527_v33  ;;  %2322 = vmatprep.mubr.msk.f32.mxu1 %vm2585_vm0, %v2584_v0 }
 0x3e7   :  { %2318 = vmatprep.subr.mxu1 %v2584_v0 }
 0x3e8   :  { %2319 = vmatpush3.msra.mxu1 %v1525_v57 }
 0x3e9   :  { %2320 = vmatprep.subr.mxu1 %v2584_v0 }
 0x3ea   :  { %2321 = vmatpush3.msra.mxu1 %v1523_v51 }
 0x3eb   :  { %2323 = vmatmul.mubr.msk.f32.vlgmr.msra.gmra.mxu1 %vm506_vm5, %v2968_v56  ;;  %2348 = vmatprep.subr.mxu1 %v2584_v0 }
 0x3ec   :  { %2325 = vmatprep.mubr.msk.f32.mxu1 %vm2585_vm0, %v2584_v0 }
 0x3ef   :  { %2326 = vmatmul.mubr.msk.f32.gmra.mxu1 %vm506_vm5, %v2960_v12 }
 0x3f0   :  { %2328 = vmatprep.mubr.msk.f32.mxu1 %vm2585_vm0, %v2584_v0 }
 0x3f3   :  { %2329 = vmatmul.mubr.msk.f32.gmra.mxu1 %vm506_vm5, %v2964_v59 }
 0x3f4   :  { %2354 = vmatprep.mubr.msk.f32.mxu1 %vm2585_vm0, %v2584_v0 }
 0x402   :  { %v612_v35 = vpop.xlane.xlu1 %611 }
 0x406   :  { %v615_v58 = vpop.xlane.xlu0 %614  ;;  %v3030_v60 = vpop.permute.xlu1 %1741 }
 0x40a   :  { %v609_v61 = vpop.xlane.xlu0 %608  ;;  %v956_v62 = vpop.permute.xlu1 %955 }
 0x40b   :  { %v958_v63 = vmul.f32 %v956_v62, %v2859_v30  ;;  %v959_v3 = vmul.f32 %v956_v62, %v2871_v43  ;;  %v960_v6 = vmul.f32 %v956_v62, %v2884_v54  ;;  %2428 = vrcp.f32 %v609_v61 }
 0x40c   :  { %2430 = vrcp.f32 %v612_v35 }
 0x40d   :  { %v961_v2 = vsel %vm860_vm3, %v958_v63, 0.0  ;;  %v964_v5 = vsel %vm860_vm3, %v959_v3, 0.0  ;;  %v968_v9 = vsel %vm967_vm4, %v960_v6, 0.0  ;;  %2432 = vrcp.f32 %v615_v58 }
 0x40e   :  { %v3035_v4 = vpop.permute.xlu0 %1624  ;;  %962 = vadd.xlane.f32.xlu0 %v961_v2 }
 0x412   :  { %v1427_v7 = vpop.permute.xlu0 %1426  ;;  %965 = vadd.xlane.f32.xlu0 %v964_v5 }
 0x413   :  { %v1430_v8 = vmul.f32 %v1427_v7, %v1331_v52  ;;  %v1429_v12 = vmul.f32 %v1427_v7, %v1330_v42  ;;  %v1431_v30 = vmul.f32 %v1427_v7, %v1332_v45  ;;  %v1727_v45 = vpop.permute.xlu1 %1726 }
 0x415   :  { %v1435_v10 = vsel %vm860_vm3, %v1430_v8, 0.0  ;;  %v1432_v43 = vsel %vm860_vm3, %v1429_v12, 0.0  ;;  %v1438_v59 = vsel %vm967_vm4, %v1431_v30, 0.0 }
 0x416   :  { %969 = vadd.xlane.f32.xlu0 %v968_v9  ;;  %1436 = vadd.xlane.f32.xlu1 %v1435_v10 }
 0x418   :  { %v2429_v46 = vpop.eup %2428 }
 0x419   :  { %v1042_v1 = vpop.f32.mrf.mxu1  ;;  %v2431_v53 = vpop.eup %2430 }
 0x41a   :  { %1433 = vadd.xlane.f32.xlu0 %v1432_v43  ;;  %1439 = vadd.xlane.f32.xlu1 %v1438_v59  ;;  %v1219_v42 = vadd.f32 %v2993_v40, %v1042_v1  ;;  %v2433_v57 = vpop.eup %2432 }
 0x41b   :  { %v2248_v13 = vpop.f32.mrf.mxu1 }
 0x421   :  { %v1121_v54 = vpop.f32.mrf.mxu1 }
 0x422   :  { %v1122_v20 = vadd.f32 %v1121_v54, %v2982_v18 }
 0x423   :  { %v2259_v56 = vpop.f32.mrf.mxu1 }
 0x425   :  { %v1126_v48 = vpop.f32.mrf.mxu1 }
 0x426   :  { %v1127_v27 = vadd.f32 %v1126_v48, %v2986_v23 }
 0x427   :  { %v2262_v14 = vpop.f32.mrf.mxu1 }
 0x429   :  { %v1131_v15 = vpop.f32.mrf.mxu1 }
 0x42a   :  { %v1132_v34 = vadd.f32 %v1131_v15, %v2990_v25 }
 0x42b   :  { %v2265_v17 = vpop.f32.mrf.mxu1 }
 0x43f   :  { %v1140_v9 = vpop.xlane.xlu1 %1139 }
 0x443   :  { %v1144_v30 = vpop.xlane.xlu1 %1143 }
 0x447   :  { %v1148_v54 = vpop.xlane.xlu1 %1147 }
 0x491   :  { %v1412_v24 = vpop.f32.mrf.mxu1 }
 0x492   :  { %v3048_v26 = vadd.f32 %v1412_v24, %v1122_v20 }
 0x493   :  { %v2300_v31 = vpop.f32.mrf.mxu1 }
 0x495   :  { %v1417_v29 = vpop.f32.mrf.mxu1 }
 0x496   :  { %v3051_v38 = vadd.f32 %v1417_v29, %v1127_v27 }
 0x497   :  { %v2303_v32 = vpop.f32.mrf.mxu1  ;;  %v963_v7 = vpop.xlane.xlu0 %962 }
 0x498   :  { %v1141_v22 = vadd.f32 %v1140_v9, %v963_v7 }
 0x499   :  { %v1422_v37 = vpop.f32.mrf.mxu1 }
 0x49a   :  { %v1517_v39 = vadd.f32 %v1422_v37, %v1132_v34 }
 0x49b   :  { %v2306_v41 = vpop.f32.mrf.mxu1  ;;  %v966_v8 = vpop.xlane.xlu0 %965 }
 0x49c   :  { %v1145_v20 = vadd.f32 %v1144_v30, %v966_v8 }
 0x49f   :  { %v970_v10 = vpop.xlane.xlu0 %969  ;;  %v1437_v16 = vpop.xlane.xlu1 %1436 }
 0x4a0   :  { %v1149_v24 = vadd.f32 %v1148_v54, %v970_v10  ;;  %v1519_v29 = vadd.f32 %v1437_v16, %v1145_v20 }
 0x4a3   :  { %v1434_v43 = vpop.xlane.xlu0 %1433  ;;  %v1440_v21 = vpop.xlane.xlu1 %1439 }
 0x4a4   :  { %v1518_v32 = vadd.f32 %v1434_v43, %v1141_v22 }
 0x4a5   :  { %v1511_v18 = vpop.f32.mrf.mxu1 }
 0x4a6   :  { %v3055_v28 = vadd.f32 %v1511_v18, %v1219_v42 }
 0x4a7   :  { %v2315_v36 = vpop.f32.mrf.mxu1 }
 0x4ab   :  { %v1607_v23 = vpop.f32.mrf.mxu1 }
 0x4ac   :  { %v1621_v47 = vmul.f32 %v2429_v46, %v1607_v23 }
 0x4ad   :  { %v2324_v49 = vpop.f32.mrf.mxu1 }
 0x4ae   :  { %v1627_v52 = vadd.f32 %v3035_v4, %v1621_v47 }
 0x4af   :  { %v1612_v25 = vpop.f32.mrf.mxu1 }
 0x4b0   :  { %v1630_v55 = vmax.f32 %v1627_v52, 0.0  ;;  %v1622_v44 = vmul.f32 %v2431_v53, %v1612_v25  ;;  %v2446_v25 = vld [vmem:[#allocation10 + $0x8] sm:$0xff] }
 0x4b1   :  { %v2327_v50 = vpop.f32.mrf.mxu1 }
 0x4b2   :  { %v1628_v33 = vadd.f32 %v3035_v4, %v1622_v44  ;;  %2340 = vmatmul.mubr.msk.f32.vlgmr.msra.gmra.mxu0 %vm860_vm3, %v1630_v55  ;;  %v1729_v40 = vmul.f32 %v1727_v45, %v1630_v55 }
 0x4b3   :  { %v1617_v51 = vpop.f32.mrf.mxu1  ;;  %2342 = vmatprep.mubr.msk.f32.mxu0 %vm2585_vm0, %v2584_v0 }
 0x4b4   :  { %v1631_v35 = vmax.f32 %v1628_v33, 0.0  ;;  %v1623_v58 = vmul.f32 %v2433_v57, %v1617_v51  ;;  %v1732_v61 = vsel %vm860_vm3, %v1729_v40, 0.0  ;;  %v2448_v33 = vld [vmem:[#allocation10 + $0x10] sm:$0x7] }
 0x4b5   :  { %1733 = vadd.xlane.f32.xlu0 %v1732_v61  ;;  %v2330_v62 = vpop.f32.mrf.mxu1 }
 0x4b6   :  { %v1629_v63 = vadd.f32 %v3035_v4, %v1623_v58  ;;  %2343 = vmatmul.mubr.msk.f32.gmra.mxu0 %vm860_vm3, %v1631_v35  ;;  %v1730_v2 = vmul.f32 %v1727_v45, %v1631_v35 }
 0x4b7   :  { %2345 = vmatprep.mubr.msk.f32.mxu0 %vm2585_vm0, %v2584_v0 }
 0x4b8   :  { %v1632_v3 = vmax.f32 %v1629_v63, 0.0  ;;  %v1735_v5 = vsel %vm860_vm3, %v1730_v2, 0.0 }
 0x4b9   :  { %1736 = vadd.xlane.f32.xlu0 %v1735_v5 }
 0x4ba   :  { %2346 = vmatmul.mubr.msk.f32.gmra.mxu0 %vm860_vm3, %v1632_v3  ;;  %2349 = vmatpush3.xpose.msk.msra.mxu1 %vm860_vm3, %v1632_v3  ;;  %v1731_v6 = vmul.f32 %v1727_v45, %v1632_v3 }
 0x4bb   :  { %2350 = vmatprep.subr.mxu1 %v2584_v0  ;;  %2363 = vmatprep.mubr.msk.f32.mxu0 %vm2585_vm0, %v2584_v0 }
 0x4bc   :  { %v1738_v4 = vsel %vm967_vm4, %v1731_v6, 0.0 }
 0x4bd   :  { %1739 = vadd.xlane.f32.xlu0 %v1738_v4 }
 0x4be   :  { %2351 = vmatpush3.xpose.msk.msra.mxu1 %vm860_vm3, %v1631_v35 }
 0x4bf   :  { %2352 = vmatprep.subr.mxu1 %v2584_v0 }
 0x4c2   :  { %2353 = vmatpush3.xpose.msk.msra.mxu1 %vm860_vm3, %v1630_v55 }
 0x4c5   :  { %2355 = vmatmul.mubr.msk.f32.vlgmr.msra.gmra.mxu1 %vm860_vm3, %v3030_v60 }
 0x53e   :  { %v1734_v56 = vpop.xlane.xlu0 %1733 }
 0x542   :  { %v1737_v60 = vpop.xlane.xlu0 %1736 }
 0x543   :  { %v1819_v41 = vadd.f32 %v1737_v60, %v1519_v29 }
 0x546   :  { %v1740_v31 = vpop.xlane.xlu0 %1739 }
 0x572   :  { %v1712_v12 = vpop.f32.mrf.mxu0 }
 0x573   :  { %v1815_v11 = vadd.f32 %v1712_v12, %v3048_v26 }
 0x574   :  { %v2341_v1 = vpop.f32.mrf.mxu0 }
 0x576   :  { %v1717_v59 = vpop.f32.mrf.mxu0 }
 0x577   :  { %v1816_v17 = vadd.f32 %v1717_v59, %v3051_v38  ;;  %v1520_v38 = vadd.f32 %v1440_v21, %v1149_v24  ;;  %v2056_v59 = vld [vmem:[#allocation8 + $0x9] ss:$0 sm:$0xff] }
 0x578   :  { %v2344_v13 = vpop.f32.mrf.mxu0 }
 0x579   :  { %v1820_v42 = vadd.f32 %v1740_v31, %v1520_v38 }
 0x57a   :  { %v1722_v48 = vpop.f32.mrf.mxu0 }
 0x57b   :  { %v1817_v14 = vadd.f32 %v1722_v48, %v1517_v39  ;;  %v1818_v39 = vadd.f32 %v1734_v56, %v1518_v32 }
 0x57c   :  { %v2347_v15 = vpop.f32.mrf.mxu0 }
 0x57d   :  { %2358 = vmatpush3.msk.msra.mxu0 %vm641_vm2, %v1817_v14 }
 0x57e   :  { %2359 = vmatprep.subr.mxu0 %v2584_v0 }
 0x57f   :  { %2360 = vmatpush3.msra.mxu0 %v1816_v17 }
 0x580   :  { %2361 = vmatprep.subr.mxu0 %v2584_v0 }
 0x581   :  { %2362 = vmatpush3.msra.mxu0 %v1815_v11 }
 0x585   :  { %v1811_v27 = vpop.f32.mrf.mxu1 }
 0x586   :  { %v1821_v34 = vadd.f32 %v1811_v27, %v3055_v28  ;;  %v2447_v28 = vld [vmem:[#allocation10] sm:$0xff] }
 0x587   :  { %v2356_v37 = vpop.f32.mrf.mxu1 }
 0x588   :  { %v1825_v26 = vrot.slane %v1821_v34, %v2692_v19 }
 0x58a   :  { %v1826_v18 = vadd.f32 %v1825_v26, %v1818_v39  ;;  %v1827_v36 = vadd.f32 %v1825_v26, %v1819_v41  ;;  %v1828_v46 = vadd.f32 %v1825_v26, %v1820_v42 }
 0x58c   :  { %vm1830_vm2 = vcmp.gt.f32.partialorder %v1827_v36, 0.0  ;;  %v1833_v23 = vmul.f32 0.2, %v1827_v36  ;;  %vm1829_vm6 = vcmp.gt.f32.partialorder %v1826_v18, 0.0  ;;  %v1832_v47 = vmul.f32 0.2, %v1826_v18 }
 0x58d   :  { %vm1831_vm7 = vcmp.gt.f32.partialorder %v1828_v46, 0.0  ;;  %v1834_v49 = vmul.f32 0.2, %v1828_v46 }
 0x58e   :  { %v1836_v52 = vsel %vm1830_vm2, %v1827_v36, %v1833_v23  ;;  %v1835_v53 = vsel %vm1829_vm6, %v1826_v18, %v1832_v47 }
 0x58f   :  { %v1839_v55 = vadd.f32 %v2446_v25, %v1836_v52  ;;  %v1838_v44 = vadd.f32 %v2447_v28, %v1835_v53  ;;  %v1837_v45 = vsel %vm1831_vm7, %v1828_v46, %v1834_v49 }
 0x590   :  { %v1840_v40 = vadd.f32 %v2448_v33, %v1837_v45 }
 0x591   :  { %v1844_v50 = vsel %vm506_vm5, %v1839_v55, -inf  ;;  %v1841_v19 = vsel %vm506_vm5, %v1838_v44, -inf }
 0x592   :  { %1845 = vmax.xlane.f32.xlu0 %v1844_v50  ;;  %1842 = vmax.xlane.f32.xlu1 %v1841_v19  ;;  %v1847_v57 = vsel %vm513_vm8, %v1840_v40, -inf }
 0x596   :  { %1848 = vmax.xlane.f32.xlu1 %v1847_v57 }
 0x61b   :  { %v1846_v51 = vpop.xlane.xlu0 %1845  ;;  %v1843_v35 = vpop.xlane.xlu1 %1842 }
 0x61c   :  { %v1851_v58 = vsub.f32 %v1839_v55, %v1846_v51  ;;  %v1850_v61 = vsub.f32 %v1838_v44, %v1843_v35 }
 0x61e   :  { %v1855_v62 = vmul.f32 1.442695, %v1851_v58  ;;  %v1853_v63 = vmul.f32 1.442695, %v1850_v61 }
 0x61f   :  { %v1849_v2 = vpop.xlane.xlu1 %1848 }
 0x620   :  { %2434 = vpow2.f32 %v1855_v62  ;;  %v1852_v3 = vsub.f32 %v1840_v40, %v1849_v2 }
 0x621   :  { %2436 = vpow2.f32 %v1853_v63 }
 0x622   :  { %v1857_v5 = vmul.f32 1.442695, %v1852_v3 }
 0x624   :  { %2438 = vpow2.f32 %v1857_v5 }
 0x62d   :  { %v2435_v6 = vpop.eup %2434 }
 0x62e   :  { %v2437_v4 = vpop.eup %2436  ;;  %v1862_v7 = vsel %vm506_vm5, %v2435_v6, 0.0 }
 0x62f   :  { %2364 = vmatmul.mubr.msk.f32.vlgmr.msra.gmra.mxu0 %vm506_vm5, %v2437_v4  ;;  %1863 = vadd.xlane.f32.xlu1 %v1862_v7  ;;  %v1859_v8 = vsel %vm506_vm5, %v2437_v4, 0.0 }
 0x630   :  { %1860 = vadd.xlane.f32.xlu0 %v1859_v8  ;;  %2366 = vmatprep.mubr.msk.f32.mxu0 %vm2585_vm0, %v2584_v0 }
 0x631   :  { %v2439_v9 = vpop.eup %2438 }
 0x632   :  { %v1865_v10 = vsel %vm513_vm8, %v2439_v9, 0.0 }
 0x633   :  { %2367 = vmatmul.mubr.msk.f32.gmra.mxu0 %vm506_vm5, %v2435_v6 }
 0x634   :  { %1866 = vadd.xlane.f32.xlu0 %v1865_v10  ;;  %2369 = vmatprep.mubr.msk.f32.mxu0 %vm2585_vm0, %v2584_v0 }
 0x637   :  { %2370 = vmatmul.mubr.msk.f32.gmra.mxu0 %vm506_vm5, %v2439_v9 }
 0x6b8   :  { %v1864_v30 = vpop.xlane.xlu1 %1863 }
 0x6b9   :  { %v1861_v12 = vpop.xlane.xlu0 %1860 }
 0x6ba   :  { %2440 = vrcp.f32 %v1861_v12 }
 0x6bb   :  { %2442 = vrcp.f32 %v1864_v30 }
 0x6bd   :  { %v1867_v1 = vpop.xlane.xlu0 %1866 }
 0x6be   :  { %2444 = vrcp.f32 %v1867_v1 }
 0x6c7   :  { %v2441_v43 = vpop.eup %2440 }
 0x6c8   :  { %v2443_v14 = vpop.eup %2442 }
 0x6cb   :  { %v2445_v60 = vpop.eup %2444 }
 0x6ef   :  { %v1946_v13 = vpop.f32.mrf.mxu0 }
 0x6f0   :  { %v1961_v54 = vmul.f32 %v2441_v43, %v1946_v13 }
 0x6f1   :  { %v2365_v56 = vpop.f32.mrf.mxu0 }
 0x6f2   :  { %v1970_v48 = vadd.f32 %v2056_v59, %v1961_v54 }
 0x6f3   :  { %v1951_v15 = vpop.f32.mrf.mxu0 }
 0x6f4   :  { %1973 = vst [vmem:[#allocation11] sm:$0xff] %v1970_v48  ;;  %v1963_v16 = vmul.f32 %v2443_v14, %v1951_v15 }
 0x6f5   :  { %v2368_v17 = vpop.f32.mrf.mxu0 }
 0x6f6   :  { %v1971_v0 = vadd.f32 %v2056_v59, %v1963_v16 }
 0x6f7   :  { %v1956_v11 = vpop.f32.mrf.mxu0 }
 0x6f8   :  { %1974 = vst [vmem:[#allocation11 + $0x8] sm:$0xff] %v1971_v0  ;;  %v1965_v21 = vmul.f32 %v2445_v60, %v1956_v11 }
 0x6f9   :  { %v2371_v22 = vpop.f32.mrf.mxu0 }
 0x6fa   :  { %v1972_v20 = vadd.f32 %v2056_v59, %v1965_v21 }
 0x6fc   :  { %1975 = vst [vmem:[#allocation11 + $0x10] sm:$0x7] %v1972_v20 }
 0x6fd   :  { %2560 = shalt.err (!%p2557_p1)
}
 0x6fe   :  { %1987 = dma.vmem_to_hbm [thread:$0]  %s1982_s19, 384, %s3110_s5, [#allocation4], %s2579_s23, %s2579_s23, %s2580_s24  }
 0x6ff   :  { %2575 = dma.done.wait [#allocation4], 384  }
 0x700   :  { %2576 = vsyncadd [#allocation4], 4294966912 }
 0x701   :  { %1991 = vsyncpa [#allocation3], 1 }
 0x702   :  { %1992 = vsyncpa [#allocation6], 1 }
 0x703   :  { %1993 = vsyncpa [#allocation9], 1 }
 0x704   :  { %1994 = vsyncpa [#allocation4], 1 }

</bundles_post_ra>
